<compile_context>
chip_gen: v7x
topology: tpu7x:2x2x1
jax: 0.10.0
libtpu: 0.0.40
codegen_flags: <defaults>
</compile_context>

<pallas_src>
import functools

import jax
import jax.numpy as jnp
from jax.experimental import pallas as pl
from jax.experimental.pallas import tpu as pltpu

EPS = 1e-5
LANE = 128
TILE_M_CONV = 256    # conv row tile (double-buffered patch tiles + resident weights stay << 32 MiB)
TILE_M_STATS = 512   # mem-bound stats pass row tile


def _round_up(x, m):
    return (x + m - 1) // m * m


def _chunk_grid(m_rows, tile):
    """Split the row-tile loop into (chunks, tiles_per_chunk); chunks axis is
    'parallel' so v7x's 2 TensorCores split reduction kernels."""
    tiles = m_rows // tile
    chunks = 2 if (tiles >= 2 and tiles % 2 == 0) else 1
    return chunks, tiles // chunks


# ----------------------------- Pallas kernels ------------------------------ #

def bn_stats_kernel(x_ref, sum_ref, sq_ref):
    """Per-channel sum / sum-of-squares; grid = (chunk [parallel], tile [arbitrary])."""
    @pl.when(pl.program_id(1) == 0)
    def _():
        sum_ref[...] = jnp.zeros_like(sum_ref)
        sq_ref[...] = jnp.zeros_like(sq_ref)
    x = x_ref[...]
    sum_ref[...] += jnp.sum(x, axis=0, keepdims=True)
    sq_ref[...] += jnp.sum(x * x, axis=0, keepdims=True)


def _affine_relu_mask(p_raw, scale, bias):
    """relu(p*scale + bias) with NaN-sentinel positions (conv zero-padding halo,
    row/K padding) mapped back to exactly 0.  Returns bf16 ready for the MXU."""
    p = p_raw.astype(jnp.float32)
    a = jnp.maximum(p * scale + bias, 0.0)
    a = jnp.where(jnp.isnan(p), 0.0, a)
    return a.astype(jnp.bfloat16)


def conv1_fused_kernel(p_ref, scale_ref, bias_ref, w_ref, y_ref, sum_ref, sq_ref):
    """conv1 = (BN1-affine + ReLU applied to raw-x patches) @ w1 on the MXU,
    fused with BN2 sum/sumsq accumulation (from the f32 result, before bf16 store)."""
    @pl.when(pl.program_id(1) == 0)
    def _():
        sum_ref[...] = jnp.zeros_like(sum_ref)
        sq_ref[...] = jnp.zeros_like(sq_ref)
    a = _affine_relu_mask(p_ref[...], scale_ref[...], bias_ref[...])
    y = jnp.dot(a, w_ref[...], preferred_element_type=jnp.float32)
    y_ref[...] = y.astype(y_ref.dtype)                     # bf16 intermediate
    sum_ref[...] += jnp.sum(y, axis=0, keepdims=True)
    sq_ref[...] += jnp.sum(y * y, axis=0, keepdims=True)


def conv2_fused_kernel(p_ref, scale_ref, bias_ref, w_ref, o_ref):
    """conv2 + 1x1-projection shortcut as ONE matmul: patch columns carry BN2's
    affine, appended raw-x columns carry BN1's affine, wsc is stacked under w2."""
    a = _affine_relu_mask(p_ref[...], scale_ref[...], bias_ref[...])
    o_ref[...] = jnp.dot(a, w_ref[...], preferred_element_type=jnp.float32)


def conv2_fused_add_kernel(p_ref, scale_ref, bias_ref, w_ref, sc_ref, o_ref):
    """conv2 (BN2+ReLU fused) + identity shortcut: direct f32 add of the x tile."""
    a = _affine_relu_mask(p_ref[...], scale_ref[...], bias_ref[...])
    conv = jnp.dot(a, w_ref[...], preferred_element_type=jnp.float32)
    o_ref[...] = conv + sc_ref[...]


# ----------------------------- pallas_call glue ----------------------------- #

def _resident_spec(shape, index_map):
    """Constant-index operand (weights / scale / bias): VMEM-resident across the
    grid and single-buffered so it is not double-buffered needlessly."""
    try:
        return pl.BlockSpec(shape, index_map, pipeline_mode=pl.Buffered(buffer_count=1))
    except TypeError:   # older jax without pipeline_mode: fall back to default buffering
        return pl.BlockSpec(shape, index_map)


def bn_stats(x_flat):
    Mp, C = x_flat.shape
    chunks, tpc = _chunk_grid(Mp, TILE_M_STATS)
    stat_spec = pl.BlockSpec((None, 1, C), lambda c, t: (c, 0, 0))
    return pl.pallas_call(
        bn_stats_kernel,
        out_shape=(jax.ShapeDtypeStruct((chunks, 1, C), jnp.float32),
                   jax.ShapeDtypeStruct((chunks, 1, C), jnp.float32)),
        grid=(chunks, tpc),
        in_specs=[pl.BlockSpec((TILE_M_STATS, C), lambda c, t: (c * tpc + t, 0))],
        out_specs=(stat_spec, stat_spec),
        compiler_params=pltpu.CompilerParams(
            dimension_semantics=("parallel", "arbitrary")),
    )(x_flat)


def conv1_fused(p, scale_k, bias_k, w_flat):
    Mp, K = p.shape
    Cout_p = w_flat.shape[1]
    chunks, tpc = _chunk_grid(Mp, TILE_M_CONV)
    row = lambda cols: pl.BlockSpec((TILE_M_CONV, cols), lambda c, t: (c * tpc + t, 0))
    stat_spec = pl.BlockSpec((None, 1, Cout_p), lambda c, t: (c, 0, 0))
    return pl.pallas_call(
        conv1_fused_kernel,
        out_shape=(jax.ShapeDtypeStruct((Mp, Cout_p), jnp.bfloat16),
                   jax.ShapeDtypeStruct((chunks, 1, Cout_p), jnp.float32),
                   jax.ShapeDtypeStruct((chunks, 1, Cout_p), jnp.float32)),
        grid=(chunks, tpc),
        in_specs=[row(K),
                  _resident_spec((1, K), lambda c, t: (0, 0)),
                  _resident_spec((1, K), lambda c, t: (0, 0)),
                  _resident_spec((K, Cout_p), lambda c, t: (0, 0))],
        out_specs=(row(Cout_p), stat_spec, stat_spec),
        compiler_params=pltpu.CompilerParams(
            dimension_semantics=("parallel", "arbitrary")),
    )(p, scale_k, bias_k, w_flat)


def conv2_proj(p, scale_k, bias_k, w_flat):
    Mp, K = p.shape
    Cout_p = w_flat.shape[1]
    row = lambda cols: pl.BlockSpec((TILE_M_CONV, cols), lambda i: (i, 0))
    return pl.pallas_call(
        conv2_fused_kernel,
        out_shape=jax.ShapeDtypeStruct((Mp, Cout_p), jnp.float32),
        grid=(Mp // TILE_M_CONV,),
        in_specs=[row(K),
                  _resident_spec((1, K), lambda i: (0, 0)),
                  _resident_spec((1, K), lambda i: (0, 0)),
                  _resident_spec((K, Cout_p), lambda i: (0, 0))],
        out_specs=row(Cout_p),
        compiler_params=pltpu.CompilerParams(dimension_semantics=("parallel",)),
    )(p, scale_k, bias_k, w_flat)


def conv2_add(p, scale_k, bias_k, w_flat, sc):
    Mp, K = p.shape
    Cout_p = w_flat.shape[1]
    row = lambda cols: pl.BlockSpec((TILE_M_CONV, cols), lambda i: (i, 0))
    return pl.pallas_call(
        conv2_fused_add_kernel,
        out_shape=jax.ShapeDtypeStruct((Mp, Cout_p), jnp.float32),
        grid=(Mp // TILE_M_CONV,),
        in_specs=[row(K),
                  _resident_spec((1, K), lambda i: (0, 0)),
                  _resident_spec((1, K), lambda i: (0, 0)),
                  _resident_spec((K, Cout_p), lambda i: (0, 0)),
                  row(Cout_p)],
        out_specs=row(Cout_p),
        compiler_params=pltpu.CompilerParams(dimension_semantics=("parallel",)),
    )(p, scale_k, bias_k, w_flat, sc)


# ------------------------------ wrapper (glue) ------------------------------ #

def _pad_rows(x, m):
    M = x.shape[0]
    Mp = _round_up(M, m)
    if Mp != M:
        x = jnp.pad(x, ((0, Mp - M), (0, 0)))
    return x


def _im2col_3x3_nan(x_nhwc, stride):
    """3x3, padding=1 im2col with a NaN sentinel in the halo (the in-kernel mask
    restores exact zeros there after the fused affine).  Returns (N*Ho*Wo, 9*C)
    with (kh, kw, ci) column order, K packed without per-tap lane padding."""
    N, H, W, C = x_nhwc.shape
    Ho = (H + 2 - 3) // stride + 1
    Wo = (W + 2 - 3) // stride + 1
    xp = jnp.pad(x_nhwc, ((0, 0), (1, 1), (1, 1), (0, 0)), constant_values=jnp.nan)
    cols = []
    for kh in range(3):
        for kw in range(3):
            cols.append(xp[:, kh:kh + stride * (Ho - 1) + 1:stride,
                           kw:kw + stride * (Wo - 1) + 1:stride, :])
    patches = jnp.stack(cols, axis=3)                     # (N, Ho, Wo, 9, C)
    return patches.reshape(N * Ho * Wo, 9 * C), (N, Ho, Wo)


def _pad_patches(p, m_pad, k_pad):
    """Pad rows / K with NaN: padded positions are zeroed by the in-kernel mask,
    contributing nothing to matmuls or BN stats."""
    M, K = p.shape
    return jnp.pad(p, ((0, m_pad - M), (0, k_pad - K)), constant_values=jnp.nan)


def _flatten_w3x3(w, k_pad, cout_pad, extra_rows=None):
    """PyTorch OIHW (Cout,Cin,3,3) -> (k_pad, cout_pad) bf16 with (kh,kw,ci) rows;
    optionally stacks a (Cin_extra, Cout) 1x1-projection below (fused shortcut)."""
    cout, cin = w.shape[0], w.shape[1]
    wf = jnp.transpose(w, (2, 3, 1, 0)).reshape(9 * cin, cout)
    if extra_rows is not None:
        wf = jnp.concatenate([wf, extra_rows], axis=0)
    wf = jnp.pad(wf, ((0, k_pad - wf.shape[0]), (0, cout_pad - cout)))
    return wf.astype(jnp.bfloat16)


def _bn_scale_bias(sum_parts, sq_parts, count, gamma, beta):
    """Combine per-chunk partials; fold BN (training-mode, biased var) to affine."""
    c = gamma.shape[0]
    s = jnp.sum(sum_parts, axis=0).reshape(-1)[:c]
    q = jnp.sum(sq_parts, axis=0).reshape(-1)[:c]
    mean = s / count
    var = jnp.maximum(q / count - mean * mean, 0.0)
    scale = gamma * jax.lax.rsqrt(var + EPS)
    bias = beta - mean * scale
    return scale, bias


def _affine_k(scale, bias, reps, k_pad, extra_scale=None, extra_bias=None):
    """Tile the per-channel affine across the 9 taps of the packed K dim
    (optionally appending the shortcut columns' affine); shape (1, k_pad) f32."""
    s, b = jnp.tile(scale, reps), jnp.tile(bias, reps)
    if extra_scale is not None:
        s = jnp.concatenate([s, extra_scale])
        b = jnp.concatenate([b, extra_bias])
    pad = k_pad - s.shape[0]
    s = jnp.pad(s, (0, pad)).reshape(1, k_pad).astype(jnp.float32)
    b = jnp.pad(b, (0, pad)).reshape(1, k_pad).astype(jnp.float32)
    return s, b


@functools.partial(jax.jit, static_argnames=("stride",))
def preact_block_forward(x_nchw, params, stride):
    N, Cin, H, W = x_nchw.shape
    Cout = params["w1"].shape[0]
    Cout_p = _round_up(Cout, LANE)

    x = jnp.transpose(x_nchw, (0, 2, 3, 1)).astype(jnp.float32)    # NHWC
    M1 = N * H * W

    # --- BN1 batch stats (kernel 1): read x once, channels unpadded (full-dim block) ---
    s1p, q1p = bn_stats(_pad_rows(x.reshape(M1, Cin), TILE_M_STATS))
    scale1, bias1 = _bn_scale_bias(s1p, q1p, float(M1), params["gamma1"], params["beta1"])

    # --- conv1 (kernel 2): raw-x patches (bf16, packed K=9*Cin) with BN1+ReLU fused,
    #     BN2 stats accumulated from the f32 result, y stored bf16 ---
    x_bf = x.astype(jnp.bfloat16)
    p1, (_, Ho, Wo) = _im2col_3x3_nan(x_bf, stride)
    M2 = N * Ho * Wo
    M2p = _round_up(M2, TILE_M_CONV)
    K1p = _round_up(9 * Cin, LANE)
    p1 = _pad_patches(p1, M2p, K1p)
    w1 = _flatten_w3x3(params["w1"], K1p, Cout_p)
    s1k, b1k = _affine_k(scale1, bias1, 9, K1p)
    y, s2p, q2p = conv1_fused(p1, s1k, b1k, w1)                    # bf16 (M2p, Cout_p)
    scale2, bias2 = _bn_scale_bias(s2p, q2p, float(M2), params["gamma2"], params["beta2"])

    # --- conv2 + shortcut (kernel 3 or 4), BN2+ReLU fused in-kernel ---
    y_img = y[:M2, :Cout].reshape(N, Ho, Wo, Cout)
    p2, _ = _im2col_3x3_nan(y_img, 1)

    has_proj = (stride != 1) or (Cin != Cout)
    if has_proj:
        # fold the 1x1-projection shortcut into the same matmul: append raw-x
        # (strided) columns to K (they receive BN1's affine -> relu(bn1(x))) and
        # stack wsc below w2 -> a single MXU pass produces conv2 + shortcut.
        sc_cols = x_bf[:, ::stride, ::stride, :].reshape(M2, Cin)
        p2 = jnp.concatenate([p2, sc_cols], axis=1)
        K2p = _round_up(9 * Cout + Cin, LANE)
        p2 = _pad_patches(p2, M2p, K2p)
        wsc = jnp.transpose(params["wsc"][:, :, 0, 0])             # (Cin, Cout)
        w2 = _flatten_w3x3(params["w2"], K2p, Cout_p, extra_rows=wsc)
        s2k, b2k = _affine_k(scale2, bias2, 9, K2p, extra_scale=scale1, extra_bias=bias1)
        out_flat = conv2_proj(p2, s2k, b2k, w2)
    else:
        K2p = _round_up(9 * Cout, LANE)
        p2 = _pad_patches(p2, M2p, K2p)
        w2 = _flatten_w3x3(params["w2"], K2p, Cout_p)
        s2k, b2k = _affine_k(scale2, bias2, 9, K2p)
        # identity shortcut = raw x (f32), channel-padded for a lane-dense add
        sc = jnp.pad(x.reshape(M1, Cin), ((0, M2p - M1), (0, Cout_p - Cin)))
        out_flat = conv2_add(p2, s2k, b2k, w2, sc)

    out = out_flat[:M2, :Cout].reshape(N, Ho, Wo, Cout)
    return jnp.transpose(out, (0, 3, 1, 2))                        # back to NCHW


# --------------------------- pure-JAX reference ----------------------------- #

def reference_forward(x, params, stride):
    def bn(t, g, b):
        m = jnp.mean(t, axis=(0, 2, 3), keepdims=True)
        v = jnp.mean((t - m) ** 2, axis=(0, 2, 3), keepdims=True)
        return (t - m) * jax.lax.rsqrt(v + EPS) * g[None, :, None, None] + b[None, :, None, None]

    dn = ("NCHW", "OIHW", "NCHW")
    Cin, Cout = x.shape[1], params["w1"].shape[0]
    out = jax.nn.relu(bn(x, params["gamma1"], params["beta1"]))
    if stride != 1 or Cin != Cout:
        shortcut = jax.lax.conv_general_dilated(out, params["wsc"], (stride, stride),
                                                [(0, 0), (0, 0)], dimension_numbers=dn)
    else:
        shortcut = x
    out = jax.lax.conv_general_dilated(out, params["w1"], (stride, stride),
                                       [(1, 1), (1, 1)], dimension_numbers=dn)
    out = jax.nn.relu(bn(out, params["gamma2"], params["beta2"]))
    out = jax.lax.conv_general_dilated(out, params["w2"], (1, 1),
                                       [(1, 1), (1, 1)], dimension_numbers=dn)
    return out + shortcut


# ---------------------------------- main ------------------------------------ #

def _make_params(key, in_planes, planes, with_proj):
    ks = jax.random.split(key, 7)
    p = {
        "gamma1": 1.0 + 0.1 * jax.random.normal(ks[0], (in_planes,), jnp.float32),
        "beta1":  0.1 * jax.random.normal(ks[1], (in_planes,), jnp.float32),
        "w1":     0.1 * jax.random.normal(ks[2], (planes, in_planes, 3, 3), jnp.float32),
        "gamma2": 1.0 + 0.1 * jax.random.normal(ks[3], (planes,), jnp.float32),
        "beta2":  0.1 * jax.random.normal(ks[4], (planes,), jnp.float32),
        "w2":     0.1 * jax.random.normal(ks[5], (planes, planes, 3, 3), jnp.float32),
    }
    if with_proj:
        p["wsc"] = 0.1 * jax.random.normal(ks[6], (planes, in_planes, 1, 1), jnp.float32)
    return p


if __name__ == "__main__":
    key = jax.random.PRNGKey(0)
    k_x1, k_p1, k_x2, k_p2 = jax.random.split(key, 4)

    # Case 1: projection shortcut (stride=2, in_planes=4 -> planes=8)
    x1 = jax.random.normal(k_x1, (2, 4, 16, 16), jnp.float32)
    params1 = _make_params(k_p1, in_planes=4, planes=8, with_proj=True)
    out1 = preact_block_forward(x1, params1, stride=2)
    jax.block_until_ready(out1)
    ref1 = reference_forward(x1, params1, stride=2)
    assert out1.shape == (2, 8, 8, 8), out1.shape
    assert jnp.allclose(out1, ref1, atol=5e-2, rtol=5e-2), "projection case mismatch"

    # Case 2: identity shortcut (stride=1, in_planes=planes=4)
    x2 = jax.random.normal(k_x2, (2, 4, 16, 16), jnp.float32)
    params2 = _make_params(k_p2, in_planes=4, planes=4, with_proj=False)
    out2 = preact_block_forward(x2, params2, stride=1)
    jax.block_until_ready(out2)
    ref2 = reference_forward(x2, params2, stride=1)
    assert out2.shape == (2, 4, 16, 16), out2.shape
    assert jnp.allclose(out2, ref2, atol=5e-2, rtol=5e-2), "identity case mismatch"

    print("KERNEL_OK")
</pallas_src>

<mosaic_0001>
module attributes {stable_mosaic.version = 11 : i64} {
  func.func @bn_stats_kernel(%arg0: i32, %arg1: i32, %arg2: memref<512x4xf32, #tpu.memory_space<vmem>>, %arg3: memref<1x1x4xf32, #tpu.memory_space<vmem>>, %arg4: memref<1x1x4xf32, #tpu.memory_space<vmem>>) attributes {dimension_semantics = [#tpu.dimension_semantics<parallel>, #tpu.dimension_semantics<arbitrary>], iteration_bounds = array<i64: 1, 1>, scalar_prefetch = 0 : i64, scratch_operands = 0 : i64, tpu.core_type = #tpu.core_type<tc>, window_params = [{transform_indices = @transform_0, window_bounds = array<i64: 512, 4>}, {transform_indices = @transform_1, window_bounds = array<i64: 1, 1, 4>}, {transform_indices = @transform_2, window_bounds = array<i64: 1, 1, 4>}]} {
    %c0_i32 = arith.constant 0 : i32
    %0 = arith.cmpi eq, %arg1, %c0_i32 : i32
    %1 = arith.extui %0 : i1 to i32
    %c0_i32_0 = arith.constant 0 : i32
    %2 = arith.cmpi ne, %1, %c0_i32_0 : i32
    scf.if %2 {
      %cst_15 = arith.constant 0.000000e+00 : f32
      %21 = vector.broadcast %cst_15 : f32 to vector<1x4xf32>
      %c0_16 = arith.constant 0 : index
      %c0_17 = arith.constant 0 : index
      %c0_18 = arith.constant 0 : index
      %22 = vector.load %arg3[%c0_16, %c0_17, %c0_18] : memref<1x1x4xf32, #tpu.memory_space<vmem>>, vector<1x1x4xf32>
      %23 = vector.shape_cast %22 : vector<1x1x4xf32> to vector<1x4xf32>
      %24 = vector.shape_cast %21 : vector<1x4xf32> to vector<1x1x4xf32>
      tpu.vector_store %arg3[%c0_16, %c0_17, %c0_18], %24 {strides = array<i32>} : memref<1x1x4xf32, #tpu.memory_space<vmem>>, vector<1x1x4xf32>,
      %cst_19 = arith.constant 0.000000e+00 : f32
      %25 = vector.broadcast %cst_19 : f32 to vector<1x4xf32>
      %c0_20 = arith.constant 0 : index
      %c0_21 = arith.constant 0 : index
      %c0_22 = arith.constant 0 : index
      %26 = vector.load %arg4[%c0_20, %c0_21, %c0_22] : memref<1x1x4xf32, #tpu.memory_space<vmem>>, vector<1x1x4xf32>
      %27 = vector.shape_cast %26 : vector<1x1x4xf32> to vector<1x4xf32>
      %28 = vector.shape_cast %25 : vector<1x4xf32> to vector<1x1x4xf32>
      tpu.vector_store %arg4[%c0_20, %c0_21, %c0_22], %28 {strides = array<i32>} : memref<1x1x4xf32, #tpu.memory_space<vmem>>, vector<1x1x4xf32>,
    } else {
    }
    %c0 = arith.constant 0 : index
    %c0_1 = arith.constant 0 : index
    %3 = vector.load %arg2[%c0, %c0_1] : memref<512x4xf32, #tpu.memory_space<vmem>>, vector<512x4xf32>
    %c0_2 = arith.constant 0 : index
    %c0_3 = arith.constant 0 : index
    %c0_4 = arith.constant 0 : index
    %4 = vector.load %arg3[%c0_2, %c0_3, %c0_4] : memref<1x1x4xf32, #tpu.memory_space<vmem>>, vector<1x1x4xf32>
    %5 = vector.shape_cast %4 : vector<1x1x4xf32> to vector<1x4xf32>
    %cst = arith.constant dense<0.000000e+00> : vector<4xf32>
    %6 = vector.multi_reduction <add>, %3, %cst [0] : vector<512x4xf32> to vector<4xf32>
    %7 = vector.shape_cast %6 : vector<4xf32> to vector<1x4xf32>
    %8 = arith.addf %5, %7 : vector<1x4xf32>
    %c0_5 = arith.constant 0 : index
    %c0_6 = arith.constant 0 : index
    %c0_7 = arith.constant 0 : index
    %9 = vector.load %arg3[%c0_5, %c0_6, %c0_7] : memref<1x1x4xf32, #tpu.memory_space<vmem>>, vector<1x1x4xf32>
    %10 = vector.shape_cast %9 : vector<1x1x4xf32> to vector<1x4xf32>
    %11 = vector.shape_cast %8 : vector<1x4xf32> to vector<1x1x4xf32>
    tpu.vector_store %arg3[%c0_5, %c0_6, %c0_7], %11 {strides = array<i32>} : memref<1x1x4xf32, #tpu.memory_space<vmem>>, vector<1x1x4xf32>,
    %c0_8 = arith.constant 0 : index
    %c0_9 = arith.constant 0 : index
    %c0_10 = arith.constant 0 : index
    %12 = vector.load %arg4[%c0_8, %c0_9, %c0_10] : memref<1x1x4xf32, #tpu.memory_space<vmem>>, vector<1x1x4xf32>
    %13 = vector.shape_cast %12 : vector<1x1x4xf32> to vector<1x4xf32>
    %14 = arith.mulf %3, %3 : vector<512x4xf32>
    %cst_11 = arith.constant dense<0.000000e+00> : vector<4xf32>
    %15 = vector.multi_reduction <add>, %14, %cst_11 [0] : vector<512x4xf32> to vector<4xf32>
    %16 = vector.shape_cast %15 : vector<4xf32> to vector<1x4xf32>
    %17 = arith.addf %13, %16 : vector<1x4xf32>
    %c0_12 = arith.constant 0 : index
    %c0_13 = arith.constant 0 : index
    %c0_14 = arith.constant 0 : index
    %18 = vector.load %arg4[%c0_12, %c0_13, %c0_14] : memref<1x1x4xf32, #tpu.memory_space<vmem>>, vector<1x1x4xf32>
    %19 = vector.shape_cast %18 : vector<1x1x4xf32> to vector<1x4xf32>
    %20 = vector.shape_cast %17 : vector<1x4xf32> to vector<1x1x4xf32>
    tpu.vector_store %arg4[%c0_12, %c0_13, %c0_14], %20 {strides = array<i32>} : memref<1x1x4xf32, #tpu.memory_space<vmem>>, vector<1x1x4xf32>,
    return
  }
  func.func @transform_0(%arg0: i32, %arg1: i32) -> (i32, i32) {
    %c1_i32 = arith.constant 1 : i32
    %0 = arith.muli %arg0, %c1_i32 : i32
    %1 = arith.addi %0, %arg1 : i32
    %c0_i32 = arith.constant 0 : i32
    %c0_i32_0 = arith.constant 0 : i32
    return %1, %c0_i32 : i32, i32
  }
  func.func @transform_1(%arg0: i32, %arg1: i32) -> (i32, i32, i32) {
    %c0_i32 = arith.constant 0 : i32
    %c0_i32_0 = arith.constant 0 : i32
    %c0_i32_1 = arith.constant 0 : i32
    return %arg0, %c0_i32, %c0_i32_0 : i32, i32, i32
  }
  func.func @transform_2(%arg0: i32, %arg1: i32) -> (i32, i32, i32) {
    %c0_i32 = arith.constant 0 : i32
    %c0_i32_0 = arith.constant 0 : i32
    %c0_i32_1 = arith.constant 0 : i32
    return %arg0, %c0_i32, %c0_i32_0 : i32, i32, i32
  }
}

module attributes {stable_mosaic.version = 11 : i64} {
  func.func @conv1_fused_kernel(%arg0: i32, %arg1: i32, %arg2: memref<256x128xbf16, #tpu.memory_space<vmem>>, %arg3: memref<1x128xf32, #tpu.memory_space<vmem>>, %arg4: memref<1x128xf32, #tpu.memory_space<vmem>>, %arg5: memref<128x128xbf16, #tpu.memory_space<vmem>>, %arg6: memref<256x128xbf16, #tpu.memory_space<vmem>>, %arg7: memref<1x1x128xf32, #tpu.memory_space<vmem>>, %arg8: memref<1x1x128xf32, #tpu.memory_space<vmem>>) attributes {dimension_semantics = [#tpu.dimension_semantics<parallel>, #tpu.dimension_semantics<arbitrary>], iteration_bounds = array<i64: 1, 1>, scalar_prefetch = 0 : i64, scratch_operands = 0 : i64, tpu.core_type = #tpu.core_type<tc>, window_params = [{transform_indices = @transform_0, window_bounds = array<i64: 256, 128>}, {pipeline_mode = #tpu.pipeline_mode<synchronous>, transform_indices = @transform_1, window_bounds = array<i64: 1, 128>}, {pipeline_mode = #tpu.pipeline_mode<synchronous>, transform_indices = @transform_2, window_bounds = array<i64: 1, 128>}, {pipeline_mode = #tpu.pipeline_mode<synchronous>, transform_indices = @transform_3, window_bounds = array<i64: 128, 128>}, {transform_indices = @transform_4, window_bounds = array<i64: 256, 128>}, {transform_indices = @transform_5, window_bounds = array<i64: 1, 1, 128>}, {transform_indices = @transform_6, window_bounds = array<i64: 1, 1, 128>}]} {
    %c0_i32 = arith.constant 0 : i32
    %0 = arith.cmpi eq, %arg1, %c0_i32 : i32
    %1 = arith.extui %0 : i1 to i32
    %c0_i32_0 = arith.constant 0 : i32
    %2 = arith.cmpi ne, %1, %c0_i32_0 : i32
    scf.if %2 {
      %cst_26 = arith.constant 0.000000e+00 : f32
      %38 = vector.broadcast %cst_26 : f32 to vector<1x128xf32>
      %c0_27 = arith.constant 0 : index
      %c0_28 = arith.constant 0 : index
      %c0_29 = arith.constant 0 : index
      %39 = vector.load %arg7[%c0_27, %c0_28, %c0_29] : memref<1x1x128xf32, #tpu.memory_space<vmem>>, vector<1x1x128xf32>
      %40 = vector.shape_cast %39 : vector<1x1x128xf32> to vector<1x128xf32>
      %41 = vector.shape_cast %38 : vector<1x128xf32> to vector<1x1x128xf32>
      tpu.vector_store %arg7[%c0_27, %c0_28, %c0_29], %41 {strides = array<i32>} : memref<1x1x128xf32, #tpu.memory_space<vmem>>, vector<1x1x128xf32>,
      %cst_30 = arith.constant 0.000000e+00 : f32
      %42 = vector.broadcast %cst_30 : f32 to vector<1x128xf32>
      %c0_31 = arith.constant 0 : index
      %c0_32 = arith.constant 0 : index
      %c0_33 = arith.constant 0 : index
      %43 = vector.load %arg8[%c0_31, %c0_32, %c0_33] : memref<1x1x128xf32, #tpu.memory_space<vmem>>, vector<1x1x128xf32>
      %44 = vector.shape_cast %43 : vector<1x1x128xf32> to vector<1x128xf32>
      %45 = vector.shape_cast %42 : vector<1x128xf32> to vector<1x1x128xf32>
      tpu.vector_store %arg8[%c0_31, %c0_32, %c0_33], %45 {strides = array<i32>} : memref<1x1x128xf32, #tpu.memory_space<vmem>>, vector<1x1x128xf32>,
    } else {
    }
    %c0 = arith.constant 0 : index
    %c0_1 = arith.constant 0 : index
    %3 = vector.load %arg2[%c0, %c0_1] : memref<256x128xbf16, #tpu.memory_space<vmem>>, vector<256x128xbf16>
    %c0_2 = arith.constant 0 : index
    %c0_3 = arith.constant 0 : index
    %4 = vector.load %arg3[%c0_2, %c0_3] : memref<1x128xf32, #tpu.memory_space<vmem>>, vector<1x128xf32>
    %c0_4 = arith.constant 0 : index
    %c0_5 = arith.constant 0 : index
    %5 = vector.load %arg4[%c0_4, %c0_5] : memref<1x128xf32, #tpu.memory_space<vmem>>, vector<1x128xf32>
    %6 = arith.extf %3 : vector<256x128xbf16> to vector<256x128xf32>
    %7 = vector.broadcast %4 : vector<1x128xf32> to vector<256x128xf32>
    %8 = arith.mulf %6, %7 : vector<256x128xf32>
    %9 = vector.broadcast %5 : vector<1x128xf32> to vector<256x128xf32>
    %10 = arith.addf %8, %9 : vector<256x128xf32>
    %cst = arith.constant 0.000000e+00 : f32
    %11 = vector.broadcast %cst : f32 to vector<256x128xf32>
    %12 = arith.maximumf %10, %11 : vector<256x128xf32>
    %13 = arith.cmpf one, %6, %6 : vector<256x128xf32>
    %cst_6 = arith.constant 0.000000e+00 : f32
    %14 = vector.broadcast %cst_6 : f32 to vector<256x128xf32>
    %15 = arith.select %13, %14, %12 : vector<256x128xi1>, vector<256x128xf32>
    %16 = arith.truncf %15 : vector<256x128xf32> to vector<256x128xbf16>
    %c0_7 = arith.constant 0 : index
    %c0_8 = arith.constant 0 : index
    %17 = vector.load %arg5[%c0_7, %c0_8] : memref<128x128xbf16, #tpu.memory_space<vmem>>, vector<128x128xbf16>
    %cst_9 = arith.constant dense<0.000000e+00> : vector<256x128xf32>
    %18 = tpu.matmul %16, %17, %cst_9 {dimension_numbers = #tpu.dot_dimension_numbers<[1], [0], [0], [1], [0, 0, 1, 1], [], []>} : vector<256x128xbf16>, vector<128x128xbf16>, vector<256x128xf32> -> vector<256x128xf32>
    %19 = arith.truncf %18 : vector<256x128xf32> to vector<256x128xbf16>
    %c0_10 = arith.constant 0 : index
    %c0_11 = arith.constant 0 : index
    %20 = vector.load %arg6[%c0_10, %c0_11] : memref<256x128xbf16, #tpu.memory_space<vmem>>, vector<256x128xbf16>
    tpu.vector_store %arg6[%c0_10, %c0_11], %19 {strides = array<i32>} : memref<256x128xbf16, #tpu.memory_space<vmem>>, vector<256x128xbf16>,
    %c0_12 = arith.constant 0 : index
    %c0_13 = arith.constant 0 : index
    %c0_14 = arith.constant 0 : index
    %21 = vector.load %arg7[%c0_12, %c0_13, %c0_14] : memref<1x1x128xf32, #tpu.memory_space<vmem>>, vector<1x1x128xf32>
    %22 = vector.shape_cast %21 : vector<1x1x128xf32> to vector<1x128xf32>
    %cst_15 = arith.constant dense<0.000000e+00> : vector<128xf32>
    %23 = vector.multi_reduction <add>, %18, %cst_15 [0] : vector<256x128xf32> to vector<128xf32>
    %24 = vector.shape_cast %23 : vector<128xf32> to vector<1x128xf32>
    %25 = arith.addf %22, %24 : vector<1x128xf32>
    %c0_16 = arith.constant 0 : index
    %c0_17 = arith.constant 0 : index
    %c0_18 = arith.constant 0 : index
    %26 = vector.load %arg7[%c0_16, %c0_17, %c0_18] : memref<1x1x128xf32, #tpu.memory_space<vmem>>, vector<1x1x128xf32>
    %27 = vector.shape_cast %26 : vector<1x1x128xf32> to vector<1x128xf32>
    %28 = vector.shape_cast %25 : vector<1x128xf32> to vector<1x1x128xf32>
    tpu.vector_store %arg7[%c0_16, %c0_17, %c0_18], %28 {strides = array<i32>} : memref<1x1x128xf32, #tpu.memory_space<vmem>>, vector<1x1x128xf32>,
    %c0_19 = arith.constant 0 : index
    %c0_20 = arith.constant 0 : index
    %c0_21 = arith.constant 0 : index
    %29 = vector.load %arg8[%c0_19, %c0_20, %c0_21] : memref<1x1x128xf32, #tpu.memory_space<vmem>>, vector<1x1x128xf32>
    %30 = vector.shape_cast %29 : vector<1x1x128xf32> to vector<1x128xf32>
    %31 = arith.mulf %18, %18 : vector<256x128xf32>
    %cst_22 = arith.constant dense<0.000000e+00> : vector<128xf32>
    %32 = vector.multi_reduction <add>, %31, %cst_22 [0] : vector<256x128xf32> to vector<128xf32>
    %33 = vector.shape_cast %32 : vector<128xf32> to vector<1x128xf32>
    %34 = arith.addf %30, %33 : vector<1x128xf32>
    %c0_23 = arith.constant 0 : index
    %c0_24 = arith.constant 0 : index
    %c0_25 = arith.constant 0 : index
    %35 = vector.load %arg8[%c0_23, %c0_24, %c0_25] : memref<1x1x128xf32, #tpu.memory_space<vmem>>, vector<1x1x128xf32>
    %36 = vector.shape_cast %35 : vector<1x1x128xf32> to vector<1x128xf32>
    %37 = vector.shape_cast %34 : vector<1x128xf32> to vector<1x1x128xf32>
    tpu.vector_store %arg8[%c0_23, %c0_24, %c0_25], %37 {strides = array<i32>} : memref<1x1x128xf32, #tpu.memory_space<vmem>>, vector<1x1x128xf32>,
    return
  }
  func.func @transform_0(%arg0: i32, %arg1: i32) -> (i32, i32) {
    %c1_i32 = arith.constant 1 : i32
    %0 = arith.muli %arg0, %c1_i32 : i32
    %1 = arith.addi %0, %arg1 : i32
    %c0_i32 = arith.constant 0 : i32
    %c0_i32_0 = arith.constant 0 : i32
    return %1, %c0_i32 : i32, i32
  }
  func.func @transform_1(%arg0: i32, %arg1: i32) -> (i32, i32) {
    %c0_i32 = arith.constant 0 : i32
    %c0_i32_0 = arith.constant 0 : i32
    %c0_i32_1 = arith.constant 0 : i32
    return %c0_i32, %c0_i32_0 : i32, i32
  }
  func.func @transform_2(%arg0: i32, %arg1: i32) -> (i32, i32) {
    %c0_i32 = arith.constant 0 : i32
    %c0_i32_0 = arith.constant 0 : i32
    %c0_i32_1 = arith.constant 0 : i32
    return %c0_i32, %c0_i32_0 : i32, i32
  }
  func.func @transform_3(%arg0: i32, %arg1: i32) -> (i32, i32) {
    %c0_i32 = arith.constant 0 : i32
    %c0_i32_0 = arith.constant 0 : i32
    %c0_i32_1 = arith.constant 0 : i32
    return %c0_i32, %c0_i32_0 : i32, i32
  }
  func.func @transform_4(%arg0: i32, %arg1: i32) -> (i32, i32) {
    %c1_i32 = arith.constant 1 : i32
    %0 = arith.muli %arg0, %c1_i32 : i32
    %1 = arith.addi %0, %arg1 : i32
    %c0_i32 = arith.constant 0 : i32
    %c0_i32_0 = arith.constant 0 : i32
    return %1, %c0_i32 : i32, i32
  }
  func.func @transform_5(%arg0: i32, %arg1: i32) -> (i32, i32, i32) {
    %c0_i32 = arith.constant 0 : i32
    %c0_i32_0 = arith.constant 0 : i32
    %c0_i32_1 = arith.constant 0 : i32
    return %arg0, %c0_i32, %c0_i32_0 : i32, i32, i32
  }
  func.func @transform_6(%arg0: i32, %arg1: i32) -> (i32, i32, i32) {
    %c0_i32 = arith.constant 0 : i32
    %c0_i32_0 = arith.constant 0 : i32
    %c0_i32_1 = arith.constant 0 : i32
    return %arg0, %c0_i32, %c0_i32_0 : i32, i32, i32
  }
}

module attributes {stable_mosaic.version = 11 : i64} {
  func.func @conv2_fused_kernel(%arg0: i32, %arg1: memref<256x128xbf16, #tpu.memory_space<vmem>>, %arg2: memref<1x128xf32, #tpu.memory_space<vmem>>, %arg3: memref<1x128xf32, #tpu.memory_space<vmem>>, %arg4: memref<128x128xbf16, #tpu.memory_space<vmem>>, %arg5: memref<256x128xf32, #tpu.memory_space<vmem>>) attributes {dimension_semantics = [#tpu.dimension_semantics<parallel>], iteration_bounds = array<i64: 1>, scalar_prefetch = 0 : i64, scratch_operands = 0 : i64, tpu.core_type = #tpu.core_type<tc>, window_params = [{transform_indices = @transform_0, window_bounds = array<i64: 256, 128>}, {pipeline_mode = #tpu.pipeline_mode<synchronous>, transform_indices = @transform_1, window_bounds = array<i64: 1, 128>}, {pipeline_mode = #tpu.pipeline_mode<synchronous>, transform_indices = @transform_2, window_bounds = array<i64: 1, 128>}, {pipeline_mode = #tpu.pipeline_mode<synchronous>, transform_indices = @transform_3, window_bounds = array<i64: 128, 128>}, {transform_indices = @transform_4, window_bounds = array<i64: 256, 128>}]} {
    %c0 = arith.constant 0 : index
    %c0_0 = arith.constant 0 : index
    %0 = vector.load %arg1[%c0, %c0_0] : memref<256x128xbf16, #tpu.memory_space<vmem>>, vector<256x128xbf16>
    %c0_1 = arith.constant 0 : index
    %c0_2 = arith.constant 0 : index
    %1 = vector.load %arg2[%c0_1, %c0_2] : memref<1x128xf32, #tpu.memory_space<vmem>>, vector<1x128xf32>
    %c0_3 = arith.constant 0 : index
    %c0_4 = arith.constant 0 : index
    %2 = vector.load %arg3[%c0_3, %c0_4] : memref<1x128xf32, #tpu.memory_space<vmem>>, vector<1x128xf32>
    %3 = arith.extf %0 : vector<256x128xbf16> to vector<256x128xf32>
    %4 = vector.broadcast %1 : vector<1x128xf32> to vector<256x128xf32>
    %5 = arith.mulf %3, %4 : vector<256x128xf32>
    %6 = vector.broadcast %2 : vector<1x128xf32> to vector<256x128xf32>
    %7 = arith.addf %5, %6 : vector<256x128xf32>
    %cst = arith.constant 0.000000e+00 : f32
    %8 = vector.broadcast %cst : f32 to vector<256x128xf32>
    %9 = arith.maximumf %7, %8 : vector<256x128xf32>
    %10 = arith.cmpf one, %3, %3 : vector<256x128xf32>
    %cst_5 = arith.constant 0.000000e+00 : f32
    %11 = vector.broadcast %cst_5 : f32 to vector<256x128xf32>
    %12 = arith.select %10, %11, %9 : vector<256x128xi1>, vector<256x128xf32>
    %13 = arith.truncf %12 : vector<256x128xf32> to vector<256x128xbf16>
    %c0_6 = arith.constant 0 : index
    %c0_7 = arith.constant 0 : index
    %14 = vector.load %arg4[%c0_6, %c0_7] : memref<128x128xbf16, #tpu.memory_space<vmem>>, vector<128x128xbf16>
    %cst_8 = arith.constant dense<0.000000e+00> : vector<256x128xf32>
    %15 = tpu.matmul %13, %14, %cst_8 {dimension_numbers = #tpu.dot_dimension_numbers<[1], [0], [0], [1], [0, 0, 1, 1], [], []>} : vector<256x128xbf16>, vector<128x128xbf16>, vector<256x128xf32> -> vector<256x128xf32>
    %c0_9 = arith.constant 0 : index
    %c0_10 = arith.constant 0 : index
    %16 = vector.load %arg5[%c0_9, %c0_10] : memref<256x128xf32, #tpu.memory_space<vmem>>, vector<256x128xf32>
    tpu.vector_store %arg5[%c0_9, %c0_10], %15 {strides = array<i32>} : memref<256x128xf32, #tpu.memory_space<vmem>>, vector<256x128xf32>,
    return
  }
  func.func @transform_0(%arg0: i32) -> (i32, i32) {
    %c0_i32 = arith.constant 0 : i32
    %c0_i32_0 = arith.constant 0 : i32
    return %arg0, %c0_i32 : i32, i32
  }
  func.func @transform_1(%arg0: i32) -> (i32, i32) {
    %c0_i32 = arith.constant 0 : i32
    %c0_i32_0 = arith.constant 0 : i32
    %c0_i32_1 = arith.constant 0 : i32
    return %c0_i32, %c0_i32_0 : i32, i32
  }
  func.func @transform_2(%arg0: i32) -> (i32, i32) {
    %c0_i32 = arith.constant 0 : i32
    %c0_i32_0 = arith.constant 0 : i32
    %c0_i32_1 = arith.constant 0 : i32
    return %c0_i32, %c0_i32_0 : i32, i32
  }
  func.func @transform_3(%arg0: i32) -> (i32, i32) {
    %c0_i32 = arith.constant 0 : i32
    %c0_i32_0 = arith.constant 0 : i32
    %c0_i32_1 = arith.constant 0 : i32
    return %c0_i32, %c0_i32_0 : i32, i32
  }
  func.func @transform_4(%arg0: i32) -> (i32, i32) {
    %c0_i32 = arith.constant 0 : i32
    %c0_i32_0 = arith.constant 0 : i32
    return %arg0, %c0_i32 : i32, i32
  }
}

</mosaic_0001>

<bundles_post_ra>
// kernel: tile.28
= control target key start
LH: loop header
LB: loop body
LE: loop exit
PB: predicated region body
PF: predicated region fallthrough
CT: control target
= control target key end

     0   :  { %s28_s0 = inlined_call_operand.vmem [shape: f32[4], index: 0, kind: input, shape index: {}]   ;;  %s29_s1 = inlined_call_operand.vmem [shape: f32[9,4], index: 1, kind: output, shape index: {}]  }
   0x1   :  { %v4_v0 = vld [vmem:[%s28_s0] ss:$0 sm:$0xff] }
   0x2   :  { %5 = vst [vmem:[%s29_s1] sm:$0xff] %v4_v0  ;;  %8 = vst [vmem:[%s29_s1 + $0x8] sm:$0xff] %v4_v0 }

// kernel: tile.29
= control target key start
LH: loop header
LB: loop body
LE: loop exit
PB: predicated region body
PF: predicated region fallthrough
CT: control target
= control target key end

     0   :  { %s75_s10 = smov 32   ;;  %s76_s11 = smov 24   ;;  %vm3_vm0 = vcmask 31744   ;;  %vm9_vm1 = vcmask 294144   ;;  %vm15_vm2 = vcmask 261344   ;;  %vm21_vm3 = vcmask 228544   ;;  %s123_s0 = inlined_call_operand.vmem [shape: f32[9,4], index: 0, kind: input, shape index: {}]   ;;  %s124_s1 = inlined_call_operand.vmem [shape: f32[36], index: 1, kind: output, shape index: {}]  }
   0x1   :  { %v59_v0 = vld [vmem:[%s123_s0 + $0x8] sm:$0x1]   ;;  %v61_v1 = vld [vmem:[%s123_s0 + $0x6] sm:$0x1]   ;;  %v60_v2 = vld [vmem:[%s123_s0 + $0x7] sm:$0x1]  }
   0x2   :  { %7 = vrot.lane.b32.xlu0 %v59_v0, %s75_s10  ;;  %19 = vrot.lane.b32.xlu1 %v61_v1, %s76_s11  ;;  %v62_v3 = vld [vmem:[%s123_s0 + $0x5] sm:$0x1]   ;;  %v2_v4 = vld [vmem:[%s123_s0] sm:$0x1]   ;;  %s77_s18 = smov 28   ;;  %s78_s19 = smov 20  }
   0x3   :  { %4 = vst.msk [vmem:[#allocation0] sm:$0x1] %vm3_vm0, %v2_v4   ;;  %v63_v5 = vld [vmem:[%s123_s0 + $0x4] sm:$0x1]   ;;  %v64_v6 = vld [vmem:[%s123_s0 + $0x3] sm:$0x1]  }
   0x4   :  { %s79_s24 = smov 16   ;;  %s80_s25 = smov 12   ;;  %v65_v7 = vld [vmem:[%s123_s0 + $0x2] sm:$0x1]   ;;  %v66_v8 = vld [vmem:[%s123_s0 + $0x1] sm:$0x1]  }
   0x5   :  { %s81_s0 = smov 8   ;;  %s82_s30 = smov 4   ;;  %vm27_vm4 = vcmask 195744   ;;  %vm33_vm5 = vcmask 162944   ;;  %vm39_vm6 = vcmask 130144   ;;  %vm45_vm7 = vcmask 97344  }
   0x6   :  { %13 = vrot.lane.b32.xlu0 %v60_v2, %s77_s18  ;;  %25 = vrot.lane.b32.xlu1 %v62_v3, %s78_s19  ;;  %vm51_vm8 = vcmask 64544  }
   0xa   :  { %31 = vrot.lane.b32.xlu0 %v63_v5, %s79_s24  ;;  %37 = vrot.lane.b32.xlu1 %v64_v6, %s80_s25 }
   0xe   :  { %43 = vrot.lane.b32.xlu0 %v65_v7, %s81_s0  ;;  %49 = vrot.lane.b32.xlu1 %v66_v8, %s82_s30 }
  0x74   :  { %v8_v9 = vpop.permute.xlu0 %7   ;;  %v20_v10 = vpop.permute.xlu1 %19  }
  0x75   :  { %10 = vst.msk [vmem:[#allocation0] sm:$0x1] %vm9_vm1, %v8_v9  }
  0x78   :  { %v14_v11 = vpop.permute.xlu0 %13   ;;  %v26_v12 = vpop.permute.xlu1 %25  }
  0x79   :  { %16 = vst.msk [vmem:[#allocation0] sm:$0x1] %vm15_vm2, %v14_v11  }
  0x7a   :  { %22 = vst.msk [vmem:[#allocation0] sm:$0x1] %vm21_vm3, %v20_v10  }
  0x7b   :  { %28 = vst.msk [vmem:[#allocation0] sm:$0x1] %vm27_vm4, %v26_v12  }
  0x7c   :  { %v32_v13 = vpop.permute.xlu0 %31   ;;  %v38_v14 = vpop.permute.xlu1 %37  }
  0x7d   :  { %34 = vst.msk [vmem:[#allocation0] sm:$0x1] %vm33_vm5, %v32_v13  }
  0x7e   :  { %40 = vst.msk [vmem:[#allocation0] sm:$0x1] %vm39_vm6, %v38_v14  }
  0x80   :  { %v44_v15 = vpop.permute.xlu0 %43   ;;  %v50_v16 = vpop.permute.xlu1 %49  }
  0x81   :  { %46 = vst.msk [vmem:[#allocation0] sm:$0x1] %vm45_vm7, %v44_v15  }
  0x82   :  { %52 = vst.msk [vmem:[#allocation0] sm:$0x1] %vm51_vm8, %v50_v16  }
  0x89   :  { %v56_v17 = vld [vmem:[#allocation0] sm:$0x1] }
  0x8a   :  { %58 = vst [vmem:[%s124_s1] sm:$0x1] %v56_v17 }

// kernel: tile.33
= control target key start
LH: loop header
LB: loop body
LE: loop exit
PB: predicated region body
PF: predicated region fallthrough
CT: control target
= control target key end

     0   :  { %s28_s0 = inlined_call_operand.vmem [shape: f32[8], index: 0, kind: input, shape index: {}]   ;;  %s29_s1 = inlined_call_operand.vmem [shape: f32[9,8], index: 1, kind: output, shape index: {}]  }
   0x1   :  { %v4_v0 = vld [vmem:[%s28_s0] ss:$0 sm:$0xff] }
   0x2   :  { %5 = vst [vmem:[%s29_s1] sm:$0xff] %v4_v0  ;;  %8 = vst [vmem:[%s29_s1 + $0x8] sm:$0xff] %v4_v0 }

// kernel: tile.34
= control target key start
LH: loop header
LB: loop body
LE: loop exit
PB: predicated region body
PF: predicated region fallthrough
CT: control target
= control target key end

     0   :  { %s75_s10 = smov 64   ;;  %s76_s11 = smov 48   ;;  %vm3_vm0 = vcmask 64512   ;;  %vm9_vm1 = vcmask 589312   ;;  %vm15_vm2 = vcmask 523712   ;;  %vm21_vm3 = vcmask 458112   ;;  %s123_s0 = inlined_call_operand.vmem [shape: f32[9,8], index: 0, kind: input, shape index: {}]   ;;  %s124_s1 = inlined_call_operand.vmem [shape: f32[72], index: 1, kind: output, shape index: {}]  }
   0x1   :  { %v59_v0 = vld [vmem:[%s123_s0 + $0x8] sm:$0x1]   ;;  %v61_v1 = vld [vmem:[%s123_s0 + $0x6] sm:$0x1]   ;;  %v60_v2 = vld [vmem:[%s123_s0 + $0x7] sm:$0x1]  }
   0x2   :  { %7 = vrot.lane.b32.xlu0 %v59_v0, %s75_s10  ;;  %19 = vrot.lane.b32.xlu1 %v61_v1, %s76_s11  ;;  %v62_v3 = vld [vmem:[%s123_s0 + $0x5] sm:$0x1]   ;;  %v2_v4 = vld [vmem:[%s123_s0] sm:$0x1]   ;;  %s77_s18 = smov 56   ;;  %s78_s19 = smov 40  }
   0x3   :  { %4 = vst.msk [vmem:[#allocation0] sm:$0x1] %vm3_vm0, %v2_v4   ;;  %v63_v5 = vld [vmem:[%s123_s0 + $0x4] sm:$0x1]   ;;  %v64_v6 = vld [vmem:[%s123_s0 + $0x3] sm:$0x1]  }
   0x4   :  { %s79_s24 = smov 32   ;;  %s80_s25 = smov 24   ;;  %v65_v7 = vld [vmem:[%s123_s0 + $0x2] sm:$0x1]   ;;  %v66_v8 = vld [vmem:[%s123_s0 + $0x1] sm:$0x1]  }
   0x5   :  { %s81_s0 = smov 16   ;;  %s82_s30 = smov 8   ;;  %vm27_vm4 = vcmask 392512   ;;  %vm33_vm5 = vcmask 326912   ;;  %vm39_vm6 = vcmask 261312   ;;  %vm45_vm7 = vcmask 195712  }
   0x6   :  { %13 = vrot.lane.b32.xlu0 %v60_v2, %s77_s18  ;;  %25 = vrot.lane.b32.xlu1 %v62_v3, %s78_s19  ;;  %vm51_vm8 = vcmask 130112  }
   0xa   :  { %31 = vrot.lane.b32.xlu0 %v63_v5, %s79_s24  ;;  %37 = vrot.lane.b32.xlu1 %v64_v6, %s80_s25 }
   0xe   :  { %43 = vrot.lane.b32.xlu0 %v65_v7, %s81_s0  ;;  %49 = vrot.lane.b32.xlu1 %v66_v8, %s82_s30 }
  0x74   :  { %v8_v9 = vpop.permute.xlu0 %7   ;;  %v20_v10 = vpop.permute.xlu1 %19  }
  0x75   :  { %10 = vst.msk [vmem:[#allocation0] sm:$0x1] %vm9_vm1, %v8_v9  }
  0x78   :  { %v14_v11 = vpop.permute.xlu0 %13   ;;  %v26_v12 = vpop.permute.xlu1 %25  }
  0x79   :  { %16 = vst.msk [vmem:[#allocation0] sm:$0x1] %vm15_vm2, %v14_v11  }
  0x7a   :  { %22 = vst.msk [vmem:[#allocation0] sm:$0x1] %vm21_vm3, %v20_v10  }
  0x7b   :  { %28 = vst.msk [vmem:[#allocation0] sm:$0x1] %vm27_vm4, %v26_v12  }
  0x7c   :  { %v32_v13 = vpop.permute.xlu0 %31   ;;  %v38_v14 = vpop.permute.xlu1 %37  }
  0x7d   :  { %34 = vst.msk [vmem:[#allocation0] sm:$0x1] %vm33_vm5, %v32_v13  }
  0x7e   :  { %40 = vst.msk [vmem:[#allocation0] sm:$0x1] %vm39_vm6, %v38_v14  }
  0x80   :  { %v44_v15 = vpop.permute.xlu0 %43   ;;  %v50_v16 = vpop.permute.xlu1 %49  }
  0x81   :  { %46 = vst.msk [vmem:[#allocation0] sm:$0x1] %vm45_vm7, %v44_v15  }
  0x82   :  { %52 = vst.msk [vmem:[#allocation0] sm:$0x1] %vm51_vm8, %v50_v16  }
  0x89   :  { %v56_v17 = vld [vmem:[#allocation0] sm:$0x1] }
  0x8a   :  { %58 = vst [vmem:[%s124_s1] sm:$0x1] %v56_v17 }

// kernel: preact_block_forward.3
= control target key start
LH: loop header
LB: loop body
LE: loop exit
PB: predicated region body
PF: predicated region fallthrough
CT: control target
= control target key end

     0   :  { %vm36_vm0 = vcmask 24576   ;;  %vm104_vm1 = vcmask 31744   ;;  %v456_v0 = vmov 0.0   ;;  %s1346_s0 = inlined_call_operand.vmem [shape: f32[512,4], index: 0, kind: input, shape index: {}]   ;;  %s1347_s1 = inlined_call_operand.vmem [shape: f32[1,1,4], index: 1, kind: output, shape index: {0}]   ;;  %s1348_s2 = inlined_call_operand.vmem [shape: f32[1,1,4], index: 2, kind: output, shape index: {1}]  }
   0x1   :  { %37 = vst.msk [vmem:[%s1347_s1] sm:$0x1] %vm36_vm0, %v456_v0  ;;  %38 = vst.msk [vmem:[%s1348_s2] sm:$0x1] %vm36_vm0, %v456_v0  ;;  %v483_v1 = vld [vmem:[%s1346_s0] sm:$0xff]  ;;  %v488_v2 = vld [vmem:[%s1346_s0 + $0x8] sm:$0xff] }
   0x2   :  { %v493_v3 = vld [vmem:[%s1346_s0 + $0x10] sm:$0xff]  ;;  %v105_v4 = vsel %vm104_vm1, %v483_v1, 0.0  ;;  %v106_v5 = vsel %vm104_vm1, %v488_v2, 0.0  ;;  %v504_v7 = vld [vmem:[%s1346_s0 + $0x18] sm:$0xff]  ;;  %v511_v10 = vld [vmem:[%s1346_s0 + $0x20] sm:$0xff] }
   0x3   :  { %v108_v6 = vsel %vm104_vm1, %v493_v3, 0.0  ;;  %v107_v8 = vadd.f32 %v106_v5, %v105_v4  ;;  %v110_v9 = vsel %vm104_vm1, %v504_v7, 0.0  ;;  %v112_v12 = vsel %vm104_vm1, %v511_v10, 0.0  ;;  %v518_v13 = vld [vmem:[%s1346_s0 + $0x28] sm:$0xff]  ;;  %v525_v16 = vld [vmem:[%s1346_s0 + $0x30] sm:$0xff]  ;;  %v530_v18 = vld [vmem:[%s1346_s0 + $0x38] sm:$0xff] }
   0x4   :  { %v114_v15 = vsel %vm104_vm1, %v518_v13, 0.0  ;;  %v535_v19 = vld [vmem:[%s1346_s0 + $0x40] sm:$0xff]  ;;  %v116_v20 = vsel %vm104_vm1, %v525_v16, 0.0  ;;  %v542_v21 = vld [vmem:[%s1346_s0 + $0x48] sm:$0xff]  ;;  %v547_v22 = vld [vmem:[%s1346_s0 + $0x50] sm:$0xff]  ;;  %v118_v25 = vsel %vm104_vm1, %v530_v18, 0.0 }
   0x5   :  { %v109_v11 = vadd.f32 %v108_v6, %v107_v8  ;;  %v552_v23 = vld [vmem:[%s1346_s0 + $0x58] sm:$0xff]  ;;  %v120_v26 = vsel %vm104_vm1, %v535_v19, 0.0  ;;  %v561_v27 = vld [vmem:[%s1346_s0 + $0x108] sm:$0xff]  ;;  %v566_v28 = vld [vmem:[%s1346_s0 + $0x110] sm:$0xff]  ;;  %v122_v30 = vsel %vm104_vm1, %v542_v21, 0.0  ;;  %v124_v31 = vsel %vm104_vm1, %v547_v22, 0.0 }
   0x6   :  { %v571_v29 = vld [vmem:[%s1346_s0 + $0x118] sm:$0xff]  ;;  %v579_v32 = vsel %vm104_vm1, %v552_v23, 0.0  ;;  %v584_v33 = vld [vmem:[%s1346_s0 + $0x120] sm:$0xff]  ;;  %v589_v34 = vld [vmem:[%s1346_s0 + $0x128] sm:$0xff]  ;;  %v598_v37 = vsel %vm104_vm1, %v561_v27, 0.0  ;;  %v602_v38 = vsel %vm104_vm1, %v566_v28, 0.0 }
   0x7   :  { %v111_v14 = vadd.f32 %v110_v9, %v109_v11  ;;  %v594_v35 = vld [vmem:[%s1346_s0 + $0x130] sm:$0xff]  ;;  %1367 = vst [vmem:[#allocation2_spill] sm:$0xff] %v598_v37  ;;  %1368 = vst [vmem:[#allocation3_spill] sm:$0xff] %v602_v38  ;;  %v606_v39 = vsel %vm104_vm1, %v571_v29, 0.0  ;;  %v611_v40 = vld [vmem:[%s1346_s0 + $0x138] sm:$0xff]  ;;  %v625_v43 = vsel %vm104_vm1, %v584_v33, 0.0  ;;  %v244_v37 = vmul.f32 %v493_v3, %v493_v3 }
   0x8   :  { %1369 = vst [vmem:[#allocation4_spill] sm:$0xff] %v606_v39  ;;  %v616_v41 = vld [vmem:[%s1346_s0 + $0x140] sm:$0xff]  ;;  %v621_v42 = vld [vmem:[%s1346_s0 + $0x148] sm:$0xff]  ;;  %1370 = vst [vmem:[#allocation5_spill] sm:$0xff] %v625_v43  ;;  %v629_v44 = vsel %vm104_vm1, %v589_v34, 0.0  ;;  %v633_v45 = vsel %vm104_vm1, %v594_v35, 0.0 }
   0x9   :  { %v113_v17 = vadd.f32 %v112_v12, %v111_v14  ;;  %1371 = vst [vmem:[#allocation6_spill] sm:$0xff] %v629_v44  ;;  %1372 = vst [vmem:[#allocation7_spill] sm:$0xff] %v633_v45  ;;  %v638_v46 = vld [vmem:[%s1346_s0 + $0x150] sm:$0xff]  ;;  %v643_v47 = vld [vmem:[%s1346_s0 + $0x158] sm:$0xff]  ;;  %v652_v50 = vsel %vm104_vm1, %v611_v40, 0.0  ;;  %v656_v51 = vsel %vm104_vm1, %v616_v41, 0.0 }
   0xa   :  { %v648_v48 = vld [vmem:[%s1346_s0 + $0x160] sm:$0xff]  ;;  %1373 = vst [vmem:[#allocation8_spill] sm:$0xff] %v652_v50  ;;  %1374 = vst [vmem:[#allocation9_spill] sm:$0xff] %v656_v51  ;;  %v660_v52 = vsel %vm104_vm1, %v621_v42, 0.0  ;;  %v665_v53 = vld [vmem:[%s1346_s0 + $0x168] sm:$0xff]  ;;  %v679_v56 = vsel %vm104_vm1, %v638_v46, 0.0 }
   0xb   :  { %v115_v24 = vadd.f32 %v114_v15, %v113_v17  ;;  %1375 = vst [vmem:[#allocation10_spill] sm:$0xff] %v660_v52  ;;  %v670_v54 = vld [vmem:[%s1346_s0 + $0x170] sm:$0xff]  ;;  %v675_v55 = vld [vmem:[%s1346_s0 + $0x178] sm:$0xff]  ;;  %1376 = vst [vmem:[#allocation11_spill] sm:$0xff] %v679_v56  ;;  %v683_v57 = vsel %vm104_vm1, %v643_v47, 0.0  ;;  %v687_v58 = vsel %vm104_vm1, %v648_v48, 0.0 }
   0xc   :  { %1377 = vst [vmem:[#allocation12_spill] sm:$0xff] %v683_v57  ;;  %1378 = vst [vmem:[#allocation13_spill] sm:$0xff] %v687_v58  ;;  %v692_v59 = vld [vmem:[%s1346_s0 + $0x180] sm:$0xff]  ;;  %v697_v60 = vld [vmem:[%s1346_s0 + $0x188] sm:$0xff]  ;;  %v706_v63 = vsel %vm104_vm1, %v665_v53, 0.0  ;;  %v710_v0 = vsel %vm104_vm1, %v670_v54, 0.0 }
   0xd   :  { %v117_v36 = vadd.f32 %v116_v20, %v115_v24  ;;  %v702_v61 = vld [vmem:[%s1346_s0 + $0x190] sm:$0xff]  ;;  %1379 = vst [vmem:[#allocation14_spill] sm:$0xff] %v706_v63  ;;  %1380 = vst [vmem:[#allocation15_spill] sm:$0xff] %v710_v0  ;;  %v714_v4 = vsel %vm104_vm1, %v675_v55, 0.0  ;;  %v719_v5 = vld [vmem:[%s1346_s0 + $0x198] sm:$0xff]  ;;  %v733_v9 = vsel %vm104_vm1, %v692_v59, 0.0 }
   0xe   :  { %1381 = vst [vmem:[#allocation16_spill] sm:$0xff] %v714_v4  ;;  %v724_v6 = vld [vmem:[%s1346_s0 + $0x1a0] sm:$0xff]  ;;  %v729_v8 = vld [vmem:[%s1346_s0 + $0x1a8] sm:$0xff]  ;;  %1382 = vst [vmem:[#allocation17_spill] sm:$0xff] %v733_v9  ;;  %v737_v11 = vsel %vm104_vm1, %v697_v60, 0.0  ;;  %v741_v12 = vsel %vm104_vm1, %v702_v61, 0.0 }
   0xf   :  { %v119_v49 = vadd.f32 %v118_v25, %v117_v36  ;;  %1383 = vst [vmem:[#allocation18_spill] sm:$0xff] %v737_v11  ;;  %1384 = vst [vmem:[#allocation19_spill] sm:$0xff] %v741_v12  ;;  %v746_v14 = vld [vmem:[%s1346_s0 + $0x60] sm:$0xff]  ;;  %v751_v15 = vld [vmem:[%s1346_s0 + $0x1b0] sm:$0xff]  ;;  %v765_v25 = vsel %vm104_vm1, %v719_v5, 0.0  ;;  %v773_v36 = vsel %vm104_vm1, %v729_v8, 0.0 }
  0x10   :  { %v756_v17 = vld [vmem:[%s1346_s0 + $0x1b8] sm:$0xff]  ;;  %v761_v20 = vld [vmem:[%s1346_s0 + $0x1c0] sm:$0xff]  ;;  %1385 = vst [vmem:[#allocation20_spill] sm:$0xff] %v765_v25  ;;  %1387 = vst [vmem:[#allocation22_spill] sm:$0xff] %v773_v36 }
  0x11   :  { %v121_v62 = vadd.f32 %v120_v26, %v119_v49  ;;  %v769_v26 = vsel %vm104_vm1, %v724_v6, 0.0  ;;  %v778_v49 = vld [vmem:[%s1346_s0 + $0x1c8] sm:$0xff]  ;;  %v796_v36 = vsel %vm104_vm1, %v756_v17, 0.0  ;;  %v800_v25 = vsel %vm104_vm1, %v761_v20, 0.0  ;;  %v805_v12 = vld [vmem:[%s1346_s0 + $0x1e0] sm:$0xff]  ;;  %v832_v0 = vld [vmem:[%s1346_s0 + $0x1f8] sm:$0xff] }
  0x12   :  { %1386 = vst [vmem:[#allocation21_spill] sm:$0xff] %v769_v26  ;;  %v792_v26 = vsel %vm104_vm1, %v751_v15, 0.0  ;;  %1389 = vst [vmem:[#allocation24_spill] sm:$0xff] %v796_v36  ;;  %v810_v11 = vld [vmem:[%s1346_s0 + $0x1e8] sm:$0xff]  ;;  %v819_v9 = vsel %vm104_vm1, %v778_v49, 0.0  ;;  %v854_v58 = vsel %vm104_vm1, %v832_v0, 0.0 }
  0x13   :  { %v123_v24 = vadd.f32 %v122_v30, %v121_v62  ;;  %v783_v30 = vld [vmem:[%s1346_s0 + $0x1d0] sm:$0xff]  ;;  %v788_v62 = vld [vmem:[%s1346_s0 + $0x1d8] sm:$0xff]  ;;  %1388 = vst [vmem:[#allocation23_spill] sm:$0xff] %v792_v26  ;;  %1390 = vst [vmem:[#allocation25_spill] sm:$0xff] %v800_v25 }
  0x14   :  { %v815_v26 = vld [vmem:[%s1346_s0 + $0x1f0] sm:$0xff]  ;;  %1392 = vst [vmem:[#allocation27_spill] sm:$0xff] %v819_v9  ;;  %v823_v25 = vsel %vm104_vm1, %v783_v30, 0.0  ;;  %v827_v4 = vsel %vm104_vm1, %v788_v62, 0.0  ;;  %1395 = vst [vmem:[#allocation30_spill] sm:$0xff] %v832_v0  ;;  %v842_v9 = vsel %vm104_vm1, %v810_v11, 0.0 }
  0x15   :  { %1391 = vst [vmem:[#allocation26_spill] sm:$0xff] %v815_v26  ;;  %v125_v36 = vadd.f32 %v124_v31, %v123_v24  ;;  %1393 = vst [vmem:[#allocation28_spill] sm:$0xff] %v823_v25  ;;  %v128_v31 = vsel %vm104_vm1, %v746_v14, 0.0  ;;  %v838_v24 = vsel %vm104_vm1, %v805_v12, 0.0  ;;  %v846_v25 = vsel %vm104_vm1, %v815_v26, 0.0  ;;  %v883_v56 = vld [vmem:[%s1346_s0 + $0x90] sm:$0xff] }
  0x16   :  { %1394 = vst [vmem:[#allocation29_spill] sm:$0xff] %v827_v4  ;;  %1396 = vst [vmem:[#allocation31_spill] sm:$0xff] %v838_v24  ;;  %v52_v4 = vld [vmem:[%s1346_s0 + $0x68] sm:$0xff]  ;;  %v888_v52 = vld [vmem:[%s1346_s0 + $0x98] sm:$0xff] }
  0x17   :  { %1397 = vst [vmem:[#allocation32_spill] sm:$0xff] %v842_v9  ;;  %1398 = vst [vmem:[#allocation33_spill] sm:$0xff] %v846_v25  ;;  %v127_v63 = vadd.f32 %v579_v32, %v125_v36  ;;  %v130_v24 = vsel %vm104_vm1, %v52_v4, 0.0  ;;  %v53_v9 = vld [vmem:[%s1346_s0 + $0x70] sm:$0xff]  ;;  %v863_v25 = vld [vmem:[%s1346_s0 + $0x78] sm:$0xff]  ;;  %v142_v39 = vsel %vm104_vm1, %v888_v52, 0.0 }
  0x18   :  { %1399 = vst [vmem:[#allocation34_spill] sm:$0xff] %v854_v58  ;;  %1400 = vst [vmem:[#allocation35_spill] sm:$0xff] %v863_v25  ;;  %v868_v32 = vld [vmem:[%s1346_s0 + $0x80] sm:$0xff]  ;;  %v873_v36 = vld [vmem:[%s1346_s0 + $0x88] sm:$0xff]  ;;  %v132_v58 = vsel %vm104_vm1, %v53_v9, 0.0 }
  0x19   :  { %v129_v57 = vadd.f32 %v128_v31, %v127_v63  ;;  %1401 = vst [vmem:[#allocation36_spill] sm:$0xff] %v868_v32  ;;  %1402 = vst [vmem:[#allocation37_spill] sm:$0xff] %v873_v36  ;;  %v242_v63 = vmul.f32 %v483_v1, %v483_v1  ;;  %v243_v31 = vmul.f32 %v488_v2, %v488_v2  ;;  %v893_v51 = vld [vmem:[%s1346_s0 + $0xa0] sm:$0xff]  ;;  %v134_v1 = vsel %vm104_vm1, %v863_v25, 0.0  ;;  %v904_v44 = vld [vmem:[%s1346_s0 + $0xa8] sm:$0xff] }
  0x1a   :  { %1403 = vst [vmem:[#allocation38_spill] sm:$0xff] %v883_v56  ;;  %1404 = vst [vmem:[#allocation39_spill] sm:$0xff] %v888_v52  ;;  %v136_v2 = vsel %vm104_vm1, %v868_v32, 0.0  ;;  %v138_v45 = vsel %vm104_vm1, %v873_v36, 0.0  ;;  %v909_v43 = vld [vmem:[%s1346_s0 + $0xb0] sm:$0xff]  ;;  %v144_v38 = vsel %vm104_vm1, %v893_v51, 0.0  ;;  %v245_v25 = vmul.f32 %v504_v7, %v504_v7 }
  0x1b   :  { %1405 = vst [vmem:[#allocation40_spill] sm:$0xff] %v893_v51  ;;  %v131_v50 = vadd.f32 %v130_v24, %v129_v57  ;;  %1406 = vst [vmem:[#allocation41_spill] sm:$0xff] %v904_v44  ;;  %v914_v57 = vld [vmem:[%s1346_s0 + $0xb8] sm:$0xff]  ;;  %v140_v24 = vsel %vm104_vm1, %v883_v56, 0.0  ;;  %v927_v36 = vld [vmem:[%s1346_s0 + $0xc0] sm:$0xff]  ;;  %v146_v51 = vsel %vm104_vm1, %v904_v44, 0.0 }
  0x1c   :  { %1407 = vst [vmem:[#allocation42_spill] sm:$0xff] %v909_v43  ;;  %1408 = vst [vmem:[#allocation43_spill] sm:$0xff] %v914_v57  ;;  %v932_v32 = vld [vmem:[%s1346_s0 + $0xc8] sm:$0xff]  ;;  %v937_v52 = vld [vmem:[%s1346_s0 + $0xd0] sm:$0xff]  ;;  %v943_v3 = vsel %vm104_vm1, %v909_v43, 0.0 }
  0x1d   :  { %1409 = vst [vmem:[#allocation44_spill] sm:$0xff] %v927_v36  ;;  %1410 = vst [vmem:[#allocation45_spill] sm:$0xff] %v932_v32  ;;  %v133_v56 = vadd.f32 %v132_v58, %v131_v50  ;;  %v950_v0 = vld [vmem:[%s1346_s0 + $0xd8] sm:$0xff]  ;;  %v955_v26 = vld [vmem:[%s1346_s0 + $0xe0] sm:$0xff]  ;;  %v959_v50 = vsel %vm104_vm1, %v914_v57, 0.0  ;;  %v963_v58 = vsel %vm104_vm1, %v927_v36, 0.0 }
  0x1e   :  { %1411 = vst [vmem:[#allocation46_spill] sm:$0xff] %v937_v52  ;;  %1412 = vst [vmem:[#allocation47_spill] sm:$0xff] %v950_v0  ;;  %v967_v7 = vsel %vm104_vm1, %v932_v32, 0.0  ;;  %v971_v43 = vsel %vm104_vm1, %v937_v52, 0.0  ;;  %v976_v44 = vld [vmem:[%s1346_s0 + $0xe8] sm:$0xff]  ;;  %v981_v57 = vld [vmem:[%s1346_s0 + $0xf0] sm:$0xff]  ;;  %v246_v52 = vmul.f32 %v511_v10, %v511_v10  ;;  %v250_v10 = vmul.f32 %v535_v19, %v535_v19 }
  0x1f   :  { %1413 = vst [vmem:[#allocation48_spill] sm:$0xff] %v955_v26  ;;  %1414 = vst [vmem:[#allocation49_spill] sm:$0xff] %v963_v58  ;;  %v135_v36 = vadd.f32 %v134_v1, %v133_v56  ;;  %v985_v58 = vsel %vm104_vm1, %v950_v0, 0.0  ;;  %v989_v32 = vsel %vm104_vm1, %v955_v26, 0.0  ;;  %v247_v56 = vmul.f32 %v518_v13, %v518_v13 }
  0x20   :  { %1415 = vst [vmem:[#allocation50_spill] sm:$0xff] %v967_v7  ;;  %1416 = vst [vmem:[#allocation51_spill] sm:$0xff] %v971_v43  ;;  %v995_v43 = vsel %vm104_vm1, %v976_v44, 0.0  ;;  %v999_v7 = vsel %vm104_vm1, %v981_v57, 0.0  ;;  %v248_v1 = vmul.f32 %v525_v16, %v525_v16  ;;  %v249_v26 = vmul.f32 %v530_v18, %v530_v18 }
  0x21   :  { %1417 = vst [vmem:[#allocation52_spill] sm:$0xff] %v976_v44  ;;  %1418 = vst [vmem:[#allocation53_spill] sm:$0xff] %v981_v57  ;;  %v137_v0 = vadd.f32 %v136_v2, %v135_v36  ;;  %v251_v44 = vmul.f32 %v542_v21, %v542_v21  ;;  %v252_v57 = vmul.f32 %v547_v22, %v547_v22 }
  0x22   :  { %1419 = vst [vmem:[#allocation54_spill] sm:$0xff] %v999_v7  ;;  %v253_v7 = vmul.f32 %v552_v23, %v552_v23  ;;  %v254_v13 = vmul.f32 %v746_v14, %v746_v14  ;;  %v1017_v16 = vmul.f32 %v52_v4, %v52_v4  ;;  %v1019_v2 = vmul.f32 %v53_v9, %v53_v9 }
  0x23   :  { %v139_v36 = vadd.f32 %v138_v45, %v137_v0  ;;  %v275_v18 = vmul.f32 %v561_v27, %v561_v27  ;;  %v276_v19 = vmul.f32 %v566_v28, %v566_v28  ;;  %v277_v21 = vmul.f32 %v571_v29, %v571_v29 }
  0x24   :  { %v278_v22 = vmul.f32 %v584_v33, %v584_v33  ;;  %v279_v23 = vmul.f32 %v589_v34, %v589_v34  ;;  %v280_v45 = vmul.f32 %v594_v35, %v594_v35  ;;  %v281_v4 = vmul.f32 %v611_v40, %v611_v40 }
  0x25   :  { %v141_v0 = vadd.f32 %v140_v24, %v139_v36  ;;  %v282_v27 = vmul.f32 %v616_v41, %v616_v41  ;;  %v283_v28 = vmul.f32 %v621_v42, %v621_v42  ;;  %v284_v29 = vmul.f32 %v638_v46, %v638_v46 }
  0x26   :  { %v285_v33 = vmul.f32 %v643_v47, %v643_v47  ;;  %v306_v34 = vsel %vm104_vm1, %v242_v63, 0.0  ;;  %v307_v35 = vsel %vm104_vm1, %v243_v31, 0.0  ;;  %v286_v40 = vmul.f32 %v648_v48, %v648_v48 }
  0x27   :  { %v143_v9 = vadd.f32 %v142_v39, %v141_v0  ;;  %v308_v14 = vadd.f32 %v307_v35, %v306_v34  ;;  %v309_v41 = vsel %vm104_vm1, %v244_v37, 0.0  ;;  %v287_v42 = vmul.f32 %v665_v53, %v665_v53  ;;  %v1420_v0 = vld [vmem:[#allocation26_spill] sm:$0xff] }
  0x28   :  { %v288_v46 = vmul.f32 %v670_v54, %v670_v54  ;;  %v289_v47 = vmul.f32 %v675_v55, %v675_v55  ;;  %v311_v63 = vsel %vm104_vm1, %v245_v25, 0.0  ;;  %v290_v39 = vmul.f32 %v692_v59, %v692_v59  ;;  %v1421_v34 = vld [vmem:[#allocation30_spill] sm:$0xff] }
  0x29   :  { %v145_v24 = vadd.f32 %v144_v38, %v143_v9  ;;  %v291_v48 = vmul.f32 %v697_v60, %v697_v60  ;;  %v310_v31 = vadd.f32 %v309_v41, %v308_v14  ;;  %v292_v37 = vmul.f32 %v702_v61, %v702_v61  ;;  %v1422_v41 = vld [vmem:[#allocation49_spill] sm:$0xff] }
  0x2a   :  { %v293_v53 = vmul.f32 %v719_v5, %v719_v5  ;;  %v294_v54 = vmul.f32 %v724_v6, %v724_v6  ;;  %v313_v55 = vsel %vm104_vm1, %v246_v52, 0.0  ;;  %v295_v38 = vmul.f32 %v729_v8, %v729_v8 }
  0x2b   :  { %v147_v25 = vadd.f32 %v146_v51, %v145_v24  ;;  %v296_v59 = vmul.f32 %v751_v15, %v751_v15  ;;  %v312_v60 = vadd.f32 %v311_v63, %v310_v31  ;;  %v297_v36 = vmul.f32 %v756_v17, %v756_v17 }
  0x2c   :  { %v298_v61 = vmul.f32 %v761_v20, %v761_v20  ;;  %v299_v5 = vmul.f32 %v778_v49, %v778_v49  ;;  %v315_v6 = vsel %vm104_vm1, %v247_v56, 0.0  ;;  %v300_v52 = vmul.f32 %v783_v30, %v783_v30 }
  0x2d   :  { %v149_v51 = vadd.f32 %v943_v3, %v147_v25  ;;  %v301_v8 = vmul.f32 %v788_v62, %v788_v62  ;;  %v314_v15 = vadd.f32 %v313_v55, %v312_v60  ;;  %v302_v17 = vmul.f32 %v805_v12, %v805_v12  ;;  %v1424_v25 = vld [vmem:[#allocation51_spill] sm:$0xff] }
  0x2e   :  { %v303_v20 = vmul.f32 %v810_v11, %v810_v11  ;;  %v304_v49 = vmul.f32 %v1420_v0, %v1420_v0  ;;  %v317_v56 = vsel %vm104_vm1, %v248_v1, 0.0  ;;  %v305_v30 = vmul.f32 %v1421_v34, %v1421_v34  ;;  %v1426_v34 = vld [vmem:[#allocation54_spill] sm:$0xff] }
  0x2f   :  { %v151_v3 = vadd.f32 %v959_v50, %v149_v51  ;;  %v316_v35 = vadd.f32 %v315_v6, %v314_v15  ;;  %v319_v62 = vsel %vm104_vm1, %v249_v26, 0.0  ;;  %v321_v9 = vsel %vm104_vm1, %v250_v10, 0.0 }
  0x30   :  { %v323_v12 = vsel %vm104_vm1, %v251_v44, 0.0  ;;  %v325_v14 = vsel %vm104_vm1, %v252_v57, 0.0  ;;  %v327_v11 = vsel %vm104_vm1, %v253_v7, 0.0  ;;  %v329_v1 = vsel %vm104_vm1, %v254_v13, 0.0  ;;  %v1423_v7 = vld [vmem:[#allocation50_spill] sm:$0xff] }
  0x31   :  { %v153_v63 = vadd.f32 %v1422_v41, %v151_v3  ;;  %v318_v24 = vadd.f32 %v317_v56, %v316_v35  ;;  %v1100_v50 = vsel %vm104_vm1, %v275_v18, 0.0  ;;  %v1103_v31 = vsel %vm104_vm1, %v276_v19, 0.0  ;;  %v1425_v56 = vld [vmem:[#allocation35_spill] sm:$0xff] }
  0x32   :  { %v1106_v26 = vsel %vm104_vm1, %v277_v21, 0.0  ;;  %v1109_v44 = vsel %vm104_vm1, %v278_v22, 0.0  ;;  %v1112_v57 = vsel %vm104_vm1, %v279_v23, 0.0  ;;  %v1116_v13 = vsel %vm104_vm1, %v280_v45, 0.0 }
  0x33   :  { %v155_v10 = vadd.f32 %v1423_v7, %v153_v63  ;;  %v320_v55 = vadd.f32 %v319_v62, %v318_v24  ;;  %v1119_v18 = vsel %vm104_vm1, %v281_v4, 0.0  ;;  %v1122_v19 = vsel %vm104_vm1, %v282_v27, 0.0  ;;  %v1427_v62 = vld [vmem:[#allocation36_spill] sm:$0xff] }
  0x34   :  { %v1125_v21 = vsel %vm104_vm1, %v283_v28, 0.0  ;;  %v1128_v22 = vsel %vm104_vm1, %v284_v29, 0.0  ;;  %v1131_v23 = vsel %vm104_vm1, %v285_v33, 0.0  ;;  %v1135_v45 = vsel %vm104_vm1, %v286_v40, 0.0 }
  0x35   :  { %v157_v60 = vadd.f32 %v1424_v25, %v155_v10  ;;  %v322_v6 = vadd.f32 %v321_v9, %v320_v55  ;;  %v1138_v4 = vsel %vm104_vm1, %v287_v42, 0.0  ;;  %v1141_v27 = vsel %vm104_vm1, %v288_v46, 0.0  ;;  %v1429_v10 = vld [vmem:[#allocation38_spill] sm:$0xff] }
  0x36   :  { %v1144_v28 = vsel %vm104_vm1, %v289_v47, 0.0  ;;  %v1147_v29 = vsel %vm104_vm1, %v290_v39, 0.0  ;;  %v1150_v33 = vsel %vm104_vm1, %v291_v48, 0.0  ;;  %v1154_v40 = vsel %vm104_vm1, %v292_v37, 0.0  ;;  %v1430_v25 = vld [vmem:[#allocation2_spill] sm:$0xff] }
  0x37   :  { %v159_v51 = vadd.f32 %v985_v58, %v157_v60  ;;  %v324_v15 = vadd.f32 %v323_v12, %v322_v6  ;;  %v1157_v42 = vsel %vm104_vm1, %v293_v53, 0.0  ;;  %v1160_v46 = vsel %vm104_vm1, %v294_v54, 0.0 }
  0x38   :  { %v1163_v47 = vsel %vm104_vm1, %v295_v38, 0.0  ;;  %v1166_v39 = vsel %vm104_vm1, %v296_v59, 0.0  ;;  %v1169_v48 = vsel %vm104_vm1, %v297_v36, 0.0  ;;  %v1173_v37 = vsel %vm104_vm1, %v298_v61, 0.0 }
  0x39   :  { %v161_v58 = vadd.f32 %v989_v32, %v159_v51  ;;  %v326_v0 = vadd.f32 %v325_v14, %v324_v15  ;;  %v1176_v53 = vsel %vm104_vm1, %v299_v5, 0.0  ;;  %v1179_v54 = vsel %vm104_vm1, %v300_v52, 0.0  ;;  %v1193_v32 = vld [vmem:[%s1346_s0 + $0xf8] sm:$0xff]  ;;  %v1431_v51 = vld [vmem:[#allocation39_spill] sm:$0xff] }
  0x3a   :  { %v1182_v38 = vsel %vm104_vm1, %v301_v8, 0.0  ;;  %v1185_v59 = vsel %vm104_vm1, %v302_v17, 0.0  ;;  %v1188_v36 = vsel %vm104_vm1, %v303_v20, 0.0  ;;  %v1197_v52 = vsel %vm104_vm1, %v304_v49, 0.0 }
  0x3b   :  { %v163_v61 = vadd.f32 %v995_v43, %v161_v58  ;;  %v328_v5 = vadd.f32 %v327_v11, %v326_v0  ;;  %v1200_v8 = vsel %vm104_vm1, %v305_v30, 0.0  ;;  %v166_v17 = vsel %vm104_vm1, %v1193_v32, 0.0  ;;  %v1211_v43 = vld [vmem:[%s1346_s0 + $0x100] sm:$0xff]  ;;  %v1432_v58 = vld [vmem:[#allocation3_spill] sm:$0xff] }
  0x3c   :  { %v257_v20 = vmul.f32 %v1425_v56, %v1425_v56  ;;  %v331_v3 = vsel %vm104_vm1, %v1017_v16, 0.0  ;;  %v168_v30 = vsel %vm104_vm1, %v1211_v43, 0.0  ;;  %v258_v9 = vmul.f32 %v1427_v62, %v1427_v62  ;;  %v1428_v16 = vld [vmem:[#allocation37_spill] sm:$0xff] }
  0x3d   :  { %v165_v49 = vadd.f32 %v1426_v34, %v163_v61  ;;  %v330_v35 = vadd.f32 %v329_v1, %v328_v5  ;;  %v333_v12 = vsel %vm104_vm1, %v1019_v2, 0.0  ;;  %v259_v41 = vmul.f32 %v1428_v16, %v1428_v16  ;;  %v1433_v5 = vld [vmem:[#allocation40_spill] sm:$0xff]  ;;  %v1436_v62 = vld [vmem:[#allocation5_spill] sm:$0xff] }
  0x3e   :  { %v335_v63 = vsel %vm104_vm1, %v257_v20, 0.0  ;;  %v260_v1 = vmul.f32 %v1429_v10, %v1429_v10  ;;  %v337_v55 = vsel %vm104_vm1, %v258_v9, 0.0  ;;  %v261_v2 = vmul.f32 %v1431_v51, %v1431_v51  ;;  %v1434_v20 = vld [vmem:[#allocation4_spill] sm:$0xff] }
  0x3f   :  { %v167_v14 = vadd.f32 %v166_v17, %v165_v49  ;;  %v332_v11 = vadd.f32 %v331_v3, %v330_v35  ;;  %v339_v15 = vsel %vm104_vm1, %v259_v41, 0.0  ;;  %v262_v17 = vmul.f32 %v1433_v5, %v1433_v5  ;;  %v1435_v49 = vld [vmem:[#allocation41_spill] sm:$0xff]  ;;  %v1438_v41 = vld [vmem:[#allocation6_spill] sm:$0xff] }
  0x40   :  { %v341_v56 = vsel %vm104_vm1, %v260_v1, 0.0  ;;  %v263_v35 = vmul.f32 %v1435_v49, %v1435_v49 }
  0x41   :  { %v169_v24 = vadd.f32 %v168_v30, %v167_v14  ;;  %v334_v7 = vadd.f32 %v333_v12, %v332_v11  ;;  %v343_v30 = vsel %vm104_vm1, %v261_v2, 0.0  ;;  %v1437_v14 = vld [vmem:[#allocation42_spill] sm:$0xff]  ;;  %v345_v16 = vsel %vm104_vm1, %v262_v17, 0.0 }
  0x42   :  { %v264_v11 = vmul.f32 %v1437_v14, %v1437_v14  ;;  %v347_v1 = vsel %vm104_vm1, %v263_v35, 0.0 }
  0x43   :  { %v171_v60 = vadd.f32 %v1430_v25, %v169_v24  ;;  %v336_v6 = vadd.f32 %v335_v63, %v334_v7  ;;  %v1439_v7 = vld [vmem:[#allocation43_spill] sm:$0xff] }
  0x44   :  { %v265_v10 = vmul.f32 %v1439_v7, %v1439_v7  ;;  %v349_v2 = vsel %vm104_vm1, %v264_v11, 0.0 }
  0x45   :  { %v173_v0 = vadd.f32 %v1432_v58, %v171_v60  ;;  %v338_v61 = vadd.f32 %v337_v55, %v336_v6  ;;  %v1440_v55 = vld [vmem:[#allocation7_spill] sm:$0xff]  ;;  %v1441_v6 = vld [vmem:[#allocation44_spill] sm:$0xff] }
  0x46   :  { %v266_v51 = vmul.f32 %v1441_v6, %v1441_v6  ;;  %v351_v17 = vsel %vm104_vm1, %v265_v10, 0.0 }
  0x47   :  { %v175_v3 = vadd.f32 %v1434_v20, %v173_v0  ;;  %v340_v34 = vadd.f32 %v339_v15, %v338_v61  ;;  %v1442_v15 = vld [vmem:[#allocation8_spill] sm:$0xff]  ;;  %v1443_v61 = vld [vmem:[#allocation45_spill] sm:$0xff] }
  0x48   :  { %v267_v5 = vmul.f32 %v1443_v61, %v1443_v61  ;;  %v353_v35 = vsel %vm104_vm1, %v266_v51, 0.0 }
  0x49   :  { %v177_v9 = vadd.f32 %v1436_v62, %v175_v3  ;;  %v342_v12 = vadd.f32 %v341_v56, %v340_v34  ;;  %v1444_v56 = vld [vmem:[#allocation9_spill] sm:$0xff]  ;;  %v1445_v34 = vld [vmem:[#allocation46_spill] sm:$0xff] }
  0x4a   :  { %v268_v49 = vmul.f32 %v1445_v34, %v1445_v34  ;;  %v355_v11 = vsel %vm104_vm1, %v267_v5, 0.0 }
  0x4b   :  { %v179_v63 = vadd.f32 %v1438_v41, %v177_v9  ;;  %v344_v24 = vadd.f32 %v343_v30, %v342_v12  ;;  %v1446_v30 = vld [vmem:[#allocation10_spill] sm:$0xff]  ;;  %v1447_v12 = vld [vmem:[#allocation47_spill] sm:$0xff] }
  0x4c   :  { %v269_v14 = vmul.f32 %v1447_v12, %v1447_v12  ;;  %v357_v10 = vsel %vm104_vm1, %v268_v49, 0.0  ;;  %v1455_v49 = vld [vmem:[#allocation15_spill] sm:$0xff]  ;;  %v1456_v12 = vld [vmem:[#allocation16_spill] sm:$0xff] }
  0x4d   :  { %v181_v25 = vadd.f32 %v1440_v55, %v179_v63  ;;  %v346_v60 = vadd.f32 %v345_v16, %v344_v24  ;;  %v1448_v16 = vld [vmem:[#allocation11_spill] sm:$0xff]  ;;  %v1449_v24 = vld [vmem:[#allocation48_spill] sm:$0xff] }
  0x4e   :  { %v270_v7 = vmul.f32 %v1449_v24, %v1449_v24  ;;  %v359_v51 = vsel %vm104_vm1, %v269_v14, 0.0 }
  0x4f   :  { %v183_v58 = vadd.f32 %v1442_v15, %v181_v25  ;;  %v348_v0 = vadd.f32 %v347_v1, %v346_v60  ;;  %v1450_v1 = vld [vmem:[#allocation12_spill] sm:$0xff] }
  0x50   :  { %v1451_v60 = vld [vmem:[#allocation52_spill] sm:$0xff]  ;;  %v361_v5 = vsel %vm104_vm1, %v270_v7, 0.0  ;;  %v1458_v7 = vld [vmem:[#allocation18_spill] sm:$0xff] }
  0x51   :  { %v185_v20 = vadd.f32 %v1444_v56, %v183_v58  ;;  %v350_v3 = vadd.f32 %v349_v2, %v348_v0  ;;  %v271_v6 = vmul.f32 %v1451_v60, %v1451_v60  ;;  %v1452_v2 = vld [vmem:[#allocation13_spill] sm:$0xff] }
  0x52   :  { %v1453_v0 = vld [vmem:[#allocation53_spill] sm:$0xff] }
  0x53   :  { %v187_v62 = vadd.f32 %v1446_v30, %v185_v20  ;;  %v352_v9 = vadd.f32 %v351_v17, %v350_v3  ;;  %v272_v61 = vmul.f32 %v1453_v0, %v1453_v0  ;;  %v1454_v17 = vld [vmem:[#allocation14_spill] sm:$0xff]  ;;  %v273_v3 = vmul.f32 %v1193_v32, %v1193_v32 }
  0x54   :  { %v363_v34 = vsel %vm104_vm1, %v271_v6, 0.0  ;;  %v1460_v6 = vld [vmem:[#allocation20_spill] sm:$0xff]  ;;  %v1462_v0 = vld [vmem:[#allocation22_spill] sm:$0xff] }
  0x55   :  { %v189_v41 = vadd.f32 %v1448_v16, %v187_v62  ;;  %v354_v63 = vadd.f32 %v353_v35, %v352_v9  ;;  %v274_v62 = vmul.f32 %v1211_v43, %v1211_v43  ;;  %v365_v9 = vsel %vm104_vm1, %v272_v61, 0.0 }
  0x56   :  { %v367_v16 = vsel %vm104_vm1, %v273_v3, 0.0  ;;  %v1464_v3 = vld [vmem:[#allocation24_spill] sm:$0xff] }
  0x57   :  { %v191_v55 = vadd.f32 %v1450_v1, %v189_v41  ;;  %v356_v25 = vadd.f32 %v355_v11, %v354_v63  ;;  %v1457_v41 = vld [vmem:[#allocation17_spill] sm:$0xff]  ;;  %v369_v32 = vsel %vm104_vm1, %v274_v62, 0.0  ;;  %v1466_v62 = vld [vmem:[#allocation27_spill] sm:$0xff] }
  0x59   :  { %v193_v15 = vadd.f32 %v1452_v2, %v191_v55  ;;  %v358_v58 = vadd.f32 %v357_v10, %v356_v25  ;;  %v1459_v55 = vld [vmem:[#allocation19_spill] sm:$0xff]  ;;  %v1461_v2 = vld [vmem:[#allocation21_spill] sm:$0xff] }
  0x5b   :  { %v195_v56 = vadd.f32 %v1454_v17, %v193_v15  ;;  %v360_v20 = vadd.f32 %v359_v51, %v358_v58  ;;  %v1463_v17 = vld [vmem:[#allocation23_spill] sm:$0xff] }
  0x5d   :  { %v197_v35 = vadd.f32 %v1455_v49, %v195_v56  ;;  %v362_v30 = vadd.f32 %v361_v5, %v360_v20 }
  0x5f   :  { %v199_v14 = vadd.f32 %v1456_v12, %v197_v35  ;;  %v364_v11 = vadd.f32 %v363_v34, %v362_v30  ;;  %v1465_v35 = vld [vmem:[#allocation25_spill] sm:$0xff]  ;;  %v1467_v12 = vld [vmem:[#allocation28_spill] sm:$0xff] }
  0x61   :  { %v201_v63 = vadd.f32 %v1457_v41, %v199_v14  ;;  %v366_v24 = vadd.f32 %v365_v9, %v364_v11  ;;  %v1468_v11 = vld [vmem:[#allocation29_spill] sm:$0xff]  ;;  %v1469_v41 = vld [vmem:[#allocation31_spill] sm:$0xff] }
  0x63   :  { %v203_v10 = vadd.f32 %v1458_v7, %v201_v63  ;;  %v368_v1 = vadd.f32 %v367_v16, %v366_v24  ;;  %v1470_v24 = vld [vmem:[#allocation32_spill] sm:$0xff]  ;;  %v1471_v7 = vld [vmem:[#allocation33_spill] sm:$0xff] }
  0x65   :  { %v205_v25 = vadd.f32 %v1459_v55, %v203_v10  ;;  %v370_v60 = vadd.f32 %v369_v32, %v368_v1  ;;  %v1472_v1 = vld [vmem:[#allocation34_spill] sm:$0xff] }
  0x67   :  { %v207_v43 = vadd.f32 %v1460_v6, %v205_v25  ;;  %v372_v51 = vadd.f32 %v1100_v50, %v370_v60 }
  0x69   :  { %v209_v15 = vadd.f32 %v1461_v2, %v207_v43  ;;  %v374_v58 = vadd.f32 %v1103_v31, %v372_v51 }
  0x6b   :  { %v211_v61 = vadd.f32 %v1462_v0, %v209_v15  ;;  %v376_v5 = vadd.f32 %v1106_v26, %v374_v58 }
  0x6d   :  { %v213_v56 = vadd.f32 %v1463_v17, %v211_v61  ;;  %v378_v20 = vadd.f32 %v1109_v44, %v376_v5 }
  0x6f   :  { %v215_v34 = vadd.f32 %v1464_v3, %v213_v56  ;;  %v380_v49 = vadd.f32 %v1112_v57, %v378_v20 }
  0x71   :  { %v217_v30 = vadd.f32 %v1465_v35, %v215_v34  ;;  %v382_v50 = vadd.f32 %v1116_v13, %v380_v49 }
  0x73   :  { %v219_v9 = vadd.f32 %v1466_v62, %v217_v30  ;;  %v384_v31 = vadd.f32 %v1119_v18, %v382_v50 }
  0x75   :  { %v221_v14 = vadd.f32 %v1467_v12, %v219_v9  ;;  %v386_v26 = vadd.f32 %v1122_v19, %v384_v31 }
  0x77   :  { %v223_v16 = vadd.f32 %v1468_v11, %v221_v14  ;;  %v388_v44 = vadd.f32 %v1125_v21, %v386_v26 }
  0x79   :  { %v225_v63 = vadd.f32 %v1469_v41, %v223_v16  ;;  %v390_v57 = vadd.f32 %v1128_v22, %v388_v44 }
  0x7b   :  { %v227_v32 = vadd.f32 %v1470_v24, %v225_v63  ;;  %v392_v13 = vadd.f32 %v1131_v23, %v390_v57 }
  0x7d   :  { %v229_v10 = vadd.f32 %v1471_v7, %v227_v32  ;;  %v394_v18 = vadd.f32 %v1135_v45, %v392_v13  ;;  %v103_v45 = vld [vmem:[%s1347_s1] sm:$0x1] }
  0x7f   :  { %v231_v55 = vadd.f32 %v1472_v1, %v229_v10  ;;  %v396_v19 = vadd.f32 %v1138_v4, %v394_v18 }
  0x81   :  { %v232_v25 = vrot.slane %v231_v55, 4  ;;  %v398_v60 = vadd.f32 %v1141_v27, %v396_v19 }
  0x83   :  { %v233_v21 = vadd.f32 %v232_v25, %v231_v55  ;;  %v400_v6 = vadd.f32 %v1144_v28, %v398_v60 }
  0x85   :  { %v234_v43 = vrot.slane %v233_v21, 2  ;;  %v402_v22 = vadd.f32 %v1147_v29, %v400_v6 }
  0x87   :  { %v235_v51 = vadd.f32 %v234_v43, %v233_v21  ;;  %v404_v23 = vadd.f32 %v1150_v33, %v402_v22 }
  0x89   :  { %v236_v2 = vrot.slane %v235_v51, 1  ;;  %v406_v15 = vadd.f32 %v1154_v40, %v404_v23 }
  0x8b   :  { %v237_v4 = vadd.f32 %v236_v2, %v235_v51  ;;  %v408_v58 = vadd.f32 %v1157_v42, %v406_v15 }
  0x8d   :  { %v238_v27 = vadd.f32 %v237_v4, %v103_v45  ;;  %v410_v0 = vadd.f32 %v1160_v46, %v408_v58 }
  0x8f   :  { %240 = vst.msk [vmem:[%s1347_s1] sm:$0x1] %vm36_vm0, %v238_v27  ;;  %v412_v28 = vadd.f32 %v1163_v47, %v410_v0 }
  0x91   :  { %v414_v29 = vadd.f32 %v1166_v39, %v412_v28 }
  0x93   :  { %v416_v33 = vadd.f32 %v1169_v48, %v414_v29 }
  0x95   :  { %v418_v40 = vadd.f32 %v1173_v37, %v416_v33  ;;  %v241_v37 = vld [vmem:[%s1348_s2] sm:$0x1] }
  0x97   :  { %v420_v61 = vadd.f32 %v1176_v53, %v418_v40 }
  0x99   :  { %v422_v42 = vadd.f32 %v1179_v54, %v420_v61 }
  0x9b   :  { %v424_v5 = vadd.f32 %v1182_v38, %v422_v42 }
  0x9d   :  { %v426_v46 = vadd.f32 %v1185_v59, %v424_v5 }
  0x9f   :  { %v428_v17 = vadd.f32 %v1188_v36, %v426_v46 }
  0xa1   :  { %v430_v56 = vadd.f32 %v1197_v52, %v428_v17 }
  0xa3   :  { %v432_v47 = vadd.f32 %v1200_v8, %v430_v56 }
  0xa5   :  { %v433_v20 = vrot.slane %v432_v47, 4 }
  0xa7   :  { %v434_v39 = vadd.f32 %v433_v20, %v432_v47 }
  0xa9   :  { %v435_v3 = vrot.slane %v434_v39, 2 }
  0xab   :  { %v436_v48 = vadd.f32 %v435_v3, %v434_v39 }
  0xad   :  { %v437_v34 = vrot.slane %v436_v48, 1 }
  0xaf   :  { %v438_v53 = vadd.f32 %v437_v34, %v436_v48 }
  0xb1   :  { %v439_v54 = vadd.f32 %v438_v53, %v241_v37 }
  0xb3   :  { %440 = vst.msk [vmem:[%s1348_s2] sm:$0x1] %vm36_vm0, %v439_v54 }

// kernel: preact_block_forward.4
= control target key start
LH: loop header
LB: loop body
LE: loop exit
PB: predicated region body
PF: predicated region fallthrough
CT: control target
= control target key end

     0   :  { %s1903_s3 = inlined_call_operand.vmem [shape: bf16[128,128], index: 3, kind: input, shape index: {}]   ;;  %s1904_s0 = inlined_call_operand.vmem [shape: bf16[256,128], index: 0, kind: input, shape index: {}]   ;;  %s1905_s1 = inlined_call_operand.vmem [shape: f32[1,128], index: 1, kind: input, shape index: {}]   ;;  %s1906_s2 = inlined_call_operand.vmem [shape: f32[1,128], index: 2, kind: input, shape index: {}]   ;;  %s1907_s5 = inlined_call_operand.vmem [shape: f32[1,1,128], index: 5, kind: output, shape index: {1}]   ;;  %s1908_s6 = inlined_call_operand.vmem [shape: f32[1,1,128], index: 6, kind: output, shape index: {2}]   ;;  %s1909_s4 = inlined_call_operand.vmem [shape: bf16[256,128], index: 4, kind: output, shape index: {0}]  }
   0x1   :  { %v1271_v0 = vld [vmem:[%s1903_s3] sm:$0xff]   ;;  %v1272_v1 = vld [vmem:[%s1903_s3 + $0x8] sm:$0xff]   ;;  %v1273_v2 = vld [vmem:[%s1903_s3 + $0x10] sm:$0xff]  }
   0x2   :  { %1206 = vmatprep.subr.bf16.mxu0 %v1271_v0  ;;  %1254 = vmatprep.subr.bf16.mxu1 %v1271_v0  ;;  %v1274_v3 = vld [vmem:[%s1903_s3 + $0x18] sm:$0xff]   ;;  %v1009_v4 = vld [vmem:[%s1904_s0] sm:$0xff]   ;;  %v1152_v8 = vld [vmem:[%s1904_s0 + $0x8] sm:$0xff]  }
   0x3   :  { %1207 = vmatpush3.bf16.msra.mxu0 %v1271_v0  ;;  %1262 = vmatpush3.bf16.msra.mxu1 %v1271_v0  ;;  %v1333_v5 = vld [vmem:[%s1905_s1] ss:$0 sm:$0xff]  ;;  %v1010_v6 = vunpack.c.l.bf16 %v1009_v4  ;;  %v1011_v7 = vunpack.c.h.bf16 %v1009_v4  ;;  %v1153_v9 = vld [vmem:[%s1904_s0 + $0x10] sm:$0xff]   ;;  %v1014_v11 = vunpack.c.l.bf16 %v1152_v8  ;;  %v1015_v12 = vunpack.c.h.bf16 %v1152_v8  ;;  %v1154_v26 = vld [vmem:[%s1904_s0 + $0x18] sm:$0xff]  }
   0x4   :  { %1208 = vmatprep.subr.bf16.mxu0 %v1272_v1  ;;  %1255 = vmatprep.subr.bf16.mxu1 %v1272_v1  ;;  %v1344_v10 = vld [vmem:[%s1906_s2] ss:$0 sm:$0xff]  ;;  %v1346_v13 = vunpack.c.l.bf16 %v1153_v9  ;;  %v1348_v14 = vunpack.c.h.bf16 %v1153_v9  ;;  %v1276_v32 = vld [vmem:[%s1903_s3 + $0x28] sm:$0xff]   ;;  %v1389_v34 = vunpack.c.l.bf16 %v1154_v26  ;;  %v1023_v35 = vunpack.c.h.bf16 %v1154_v26  ;;  %v1277_v47 = vld [vmem:[%s1903_s3 + $0x30] sm:$0xff]  }
   0x5   :  { %v135_v15 = vmul.f32 %v1010_v6, %v1333_v5  ;;  %v136_v16 = vmul.f32 %v1011_v7, %v1333_v5  ;;  %vm237_vm0 = vcmp.ne.f32.partialorder %v1010_v6, %v1010_v6  ;;  %vm238_vm1 = vcmp.ne.f32.partialorder %v1011_v7, %v1011_v7  ;;  %v1275_v17 = vld [vmem:[%s1903_s3 + $0x20] sm:$0xff]   ;;  %v1156_v39 = vld [vmem:[%s1904_s0 + $0x28] sm:$0xff]   ;;  %v1157_v57 = vld [vmem:[%s1904_s0 + $0x30] sm:$0xff]  }
   0x6   :  { %vm1355_vm2 = vmneg %vm238_vm1  ;;  %v137_v19 = vmul.f32 %v1014_v11, %v1333_v5  ;;  %v138_v20 = vmul.f32 %v1015_v12, %v1333_v5  ;;  %v139_v24 = vmul.f32 %v1346_v13, %v1333_v5  ;;  %v140_v25 = vmul.f32 %v1348_v14, %v1333_v5  ;;  %v1155_v29 = vld [vmem:[%s1904_s0 + $0x20] sm:$0xff]   ;;  %v1158_v60 = vld [vmem:[%s1904_s0 + $0x38] sm:$0xff]  }
   0x7   :  { %1209 = vmatpush3.bf16.msra.mxu0 %v1272_v1  ;;  %1263 = vmatpush3.bf16.msra.mxu1 %v1272_v1  ;;  %v173_v21 = vadd.f32 %v1344_v10, %v135_v15  ;;  %v174_v22 = vadd.f32 %v1344_v10, %v136_v16  ;;  %vm1363_vm3 = vmneg %vm237_vm0  ;;  %vm240_vm5 = vcmp.ne.f32.partialorder %v1015_v12, %v1015_v12  ;;  %v1394_v38 = vunpack.c.l.bf16 %v1155_v29  ;;  %v1278_v0 = vld [vmem:[%s1903_s3 + $0x38] sm:$0xff]   ;;  %v1160_v26 = vld [vmem:[%s1904_s0 + $0x48] sm:$0xff]  }
   0x8   :  { %1210 = vmatprep.subr.bf16.mxu0 %v1273_v2  ;;  %1256 = vmatprep.subr.bf16.mxu1 %v1273_v2  ;;  %v175_v27 = vadd.f32 %v1344_v10, %v137_v19  ;;  %v176_v28 = vadd.f32 %v1344_v10, %v138_v20  ;;  %vm866_vm4 = vmpackc.low %vm1355_vm2, %vm1363_vm3  ;;  %v1387_v33 = vadd.f32 %v1344_v10, %v139_v24  ;;  %v1027_v45 = vunpack.c.h.bf16 %v1155_v29 }
   0x9   :  { %v205_v30 = vmax.f32 %v173_v21, 0.0  ;;  %v206_v31 = vmax.f32 %v174_v22, 0.0  ;;  %vm239_vm6 = vcmp.ne.f32.partialorder %v1014_v11, %v1014_v11  ;;  %v1392_v37 = vadd.f32 %v1344_v10, %v140_v25  ;;  %vm1408_vm7 = vmneg %vm240_vm5 }
   0xa   :  { %v207_v40 = vmax.f32 %v175_v27, 0.0  ;;  %v208_v41 = vmax.f32 %v176_v28, 0.0  ;;  %v141_v42 = vmul.f32 %v1389_v34, %v1333_v5  ;;  %v142_v43 = vmul.f32 %v1023_v35, %v1333_v5  ;;  %vm1422_vm10 = vmneg %vm239_vm6 }
   0xb   :  { %1211 = vmatpush3.bf16.msra.mxu0 %v1273_v2  ;;  %1264 = vmatpush3.bf16.msra.mxu1 %v1273_v2  ;;  %v867_v36 = vpack.c.bf16 %v206_v31, %v205_v30  ;;  %vm241_vm8 = vcmp.ne.f32.partialorder %v1346_v13, %v1346_v13  ;;  %vm242_vm9 = vcmp.ne.f32.partialorder %v1348_v14, %v1348_v14  ;;  %v209_v49 = vmax.f32 %v1387_v33, 0.0  ;;  %vm871_vm13 = vmpackc.low %vm1408_vm7, %vm1422_vm10 }
   0xc   :  { %1212 = vmatprep.subr.bf16.mxu0 %v1274_v3  ;;  %1257 = vmatprep.subr.bf16.mxu1 %v1274_v3  ;;  %v143_v46 = vmul.f32 %v1394_v38, %v1333_v5  ;;  %v179_v50 = vadd.f32 %v1344_v10, %v141_v42  ;;  %v180_v51 = vadd.f32 %v1344_v10, %v142_v43  ;;  %v1429_v52 = vunpack.c.l.bf16 %v1156_v39  ;;  %vm1461_vm15 = vmneg %vm242_vm9 }
   0xd   :  { %1222 = vmatprep.mubr.msk.bf16.mxu0 %vm866_vm4, %v867_v36  ;;  %v210_v53 = vmax.f32 %v1392_v37, 0.0  ;;  %v144_v54 = vmul.f32 %v1027_v45, %v1333_v5  ;;  %v1434_v56 = vunpack.c.h.bf16 %v1156_v39  ;;  %v1439_v58 = vpack.c.bf16 %v208_v41, %v207_v40  ;;  %vm1471_vm0 = vmneg %vm241_vm8  ;;  %v1161_v37 = vld [vmem:[%s1904_s0 + $0x50] sm:$0xff]  }
   0xe   :  { %v181_v55 = vadd.f32 %v1344_v10, %v143_v46  ;;  %vm243_vm11 = vcmp.ne.f32.partialorder %v1389_v34, %v1389_v34  ;;  %vm244_vm12 = vcmp.ne.f32.partialorder %v1023_v35, %v1023_v35  ;;  %v145_v59 = vmul.f32 %v1429_v52, %v1333_v5 }
   0xf   :  { %1213 = vmatpush3.bf16.msra.mxu0 %v1274_v3  ;;  %1265 = vmatpush3.bf16.msra.mxu1 %v1274_v3  ;;  %v211_v61 = vmax.f32 %v179_v50, 0.0  ;;  %v182_v62 = vadd.f32 %v1344_v10, %v144_v54  ;;  %vm246_vm14 = vcmp.ne.f32.partialorder %v1027_v45, %v1027_v45  ;;  %v146_v63 = vmul.f32 %v1434_v56, %v1333_v5  ;;  %vm1479_vm1 = vmneg %vm244_vm12 }
  0x10   :  { %1214 = vmatprep.subr.bf16.mxu0 %v1275_v17  ;;  %1258 = vmatprep.subr.bf16.mxu1 %v1275_v17  ;;  %v212_v2 = vmax.f32 %v180_v51, 0.0  ;;  %v183_v3 = vadd.f32 %v1344_v10, %v145_v59  ;;  %v1466_v4 = vunpack.c.l.bf16 %v1157_v57  ;;  %v1035_v6 = vunpack.c.h.bf16 %v1157_v57  ;;  %vm1496_vm3 = vmneg %vm243_vm11 }
  0x11   :  { %v213_v8 = vmax.f32 %v181_v55, 0.0  ;;  %v214_v9 = vmax.f32 %v182_v62, 0.0  ;;  %v184_v11 = vadd.f32 %v1344_v10, %v146_v63  ;;  %v1476_v12 = vunpack.c.l.bf16 %v1158_v60  ;;  %vm1503_vm4 = vmneg %vm246_vm14 }
  0x12   :  { %vm245_vm2 = vcmp.ne.f32.partialorder %v1394_v38, %v1394_v38  ;;  %v147_v13 = vmul.f32 %v1466_v4, %v1333_v5  ;;  %v148_v15 = vmul.f32 %v1035_v6, %v1333_v5  ;;  %v1488_v16 = vunpack.c.h.bf16 %v1158_v60  ;;  %vm876_vm11 = vmpackc.low %vm1461_vm15, %vm1471_vm0  ;;  %v1163_v60 = vld [vmem:[%s1904_s0 + $0x60] sm:$0xff]  }
  0x13   :  { %1215 = vmatpush3.bf16.msra.mxu0 %v1275_v17  ;;  %1266 = vmatpush3.bf16.msra.mxu1 %v1275_v17  ;;  %v1159_v17 = vld [vmem:[%s1904_s0 + $0x40] sm:$0xff]   ;;  %v877_v18 = vpack.c.bf16 %v210_v53, %v209_v49  ;;  %v215_v20 = vmax.f32 %v183_v3, 0.0  ;;  %v216_v21 = vmax.f32 %v184_v11, 0.0  ;;  %v149_v22 = vmul.f32 %v1476_v12, %v1333_v5  ;;  %vm1525_vm8 = vmneg %vm245_vm2  ;;  %v1164_v11 = vld [vmem:[%s1904_s0 + $0x68] sm:$0xff]  }
  0x14   :  { %1216 = vmatprep.subr.bf16.mxu0 %v1276_v32  ;;  %1259 = vmatprep.subr.bf16.mxu1 %v1276_v32  ;;  %vm247_vm5 = vcmp.ne.f32.partialorder %v1429_v52, %v1429_v52  ;;  %vm248_vm6 = vcmp.ne.f32.partialorder %v1434_v56, %v1434_v56  ;;  %v1512_v24 = vadd.f32 %v1344_v10, %v147_v13  ;;  %v1042_v30 = vunpack.c.l.bf16 %v1159_v17  ;;  %v1162_v52 = vld [vmem:[%s1904_s0 + $0x58] sm:$0xff]  }
  0x15   :  { %v1515_v25 = vadd.f32 %v1344_v10, %v148_v15  ;;  %v1520_v27 = vpack.c.bf16 %v212_v2, %v211_v61  ;;  %v1529_v29 = vpack.c.bf16 %v214_v9, %v213_v8  ;;  %vm250_vm12 = vcmp.ne.f32.partialorder %v1035_v6, %v1035_v6  ;;  %vm1561_vm2 = vmneg %vm248_vm6 }
  0x16   :  { %v150_v31 = vmul.f32 %v1488_v16, %v1333_v5  ;;  %v1545_v33 = vpack.c.bf16 %v216_v21, %v215_v20  ;;  %v1548_v34 = vadd.f32 %v1344_v10, %v149_v22  ;;  %v151_v35 = vmul.f32 %v1042_v30, %v1333_v5  ;;  %vm1573_vm14 = vmneg %vm247_vm5 }
  0x17   :  { %1217 = vmatpush3.bf16.msra.mxu0 %v1276_v32  ;;  %1267 = vmatpush3.bf16.msra.mxu1 %v1276_v32  ;;  %v1043_v32 = vunpack.c.h.bf16 %v1159_v17  ;;  %v1046_v36 = vunpack.c.l.bf16 %v1160_v26  ;;  %v217_v39 = vmax.f32 %v1512_v24, 0.0  ;;  %v218_v40 = vmax.f32 %v1515_v25, 0.0  ;;  %vm1586_vm9 = vmneg %vm250_vm12 }
  0x18   :  { %1218 = vmatprep.subr.bf16.mxu0 %v1277_v47  ;;  %1260 = vmatprep.subr.bf16.mxu1 %v1277_v47  ;;  %v1933_v42 = vmov 0  ;;  %v189_v43 = vadd.f32 %v1344_v10, %v151_v35  ;;  %v1047_v45 = vunpack.c.h.bf16 %v1160_v26  ;;  %vm253_vm5 = vcmp.ne.f32.partialorder %v1042_v30, %v1042_v30 }
  0x19   :  { %v152_v41 = vmul.f32 %v1043_v32, %v1333_v5  ;;  %v1934_v42 = vsel %vm1573_vm14, 4294967295, %v1933_v42  ;;  %vm254_vm6 = vcmp.ne.f32.partialorder %v1043_v32, %v1043_v32  ;;  %v153_v46 = vmul.f32 %v1046_v36, %v1333_v5  ;;  %vm1622_vm0 = vmneg %vm253_vm5 }
  0x1a   :  { %v1050_v50 = vunpack.c.l.bf16 %v1161_v37  ;;  %v1051_v51 = vunpack.c.h.bf16 %v1161_v37  ;;  %vm1937_vm7 = vcmp.ne.f32.partialorder %v1466_v4, %v1466_v4  ;;  %v1607_v48 = vadd.f32 %v1344_v10, %v150_v31 }
  0x1b   :  { %1219 = vmatpush3.bf16.msra.mxu0 %v1277_v47  ;;  %1268 = vmatpush3.bf16.msra.mxu1 %v1277_v47  ;;  %v190_v49 = vadd.f32 %v1344_v10, %v152_v41  ;;  %vm1602_vm10 = vmneg %vm1937_vm7  ;;  %v221_v53 = vmax.f32 %v189_v43, 0.0  ;;  %v154_v54 = vmul.f32 %v1047_v45, %v1333_v5  ;;  %v191_v55 = vadd.f32 %v1344_v10, %v153_v46 }
  0x1c   :  { %1220 = vmatprep.subr.bf16.mxu0 %v1278_v0  ;;  %1261 = vmatprep.subr.bf16.mxu1 %v1278_v0  ;;  %vm256_vm15 = vcmp.ne.f32.partialorder %v1047_v45, %v1047_v45  ;;  %v156_v59 = vmul.f32 %v1051_v51, %v1333_v5  ;;  %v1055_v4 = vunpack.c.h.bf16 %v1162_v52  ;;  %v1058_v9 = vunpack.c.l.bf16 %v1163_v60 }
  0x1d   :  { %v222_v56 = vmax.f32 %v190_v49, 0.0  ;;  %v192_v62 = vadd.f32 %v1344_v10, %v154_v54  ;;  %v223_v63 = vmax.f32 %v191_v55, 0.0  ;;  %vm1638_vm5 = vmneg %vm256_vm15  ;;  %v1059_v22 = vunpack.c.h.bf16 %v1163_v60  ;;  %v1166_v49 = vld [vmem:[%s1904_s0 + $0x78] sm:$0xff]  }
  0x1e   :  { %v194_v3 = vadd.f32 %v1344_v10, %v156_v59  ;;  %v159_v26 = vmul.f32 %v1058_v9, %v1333_v5  ;;  %v1062_v35 = vunpack.c.l.bf16 %v1164_v11  ;;  %v1063_v41 = vunpack.c.h.bf16 %v1164_v11 }
  0x1f   :  { %1221 = vmatpush3.bf16.msra.mxu0 %v1278_v0  ;;  %1269 = vmatpush3.bf16.msra.mxu1 %v1278_v0  ;;  %v1054_v0 = vunpack.c.l.bf16 %v1162_v52  ;;  %v907_v1 = vpack.c.bf16 %v222_v56, %v221_v53  ;;  %v224_v6 = vmax.f32 %v192_v62, 0.0  ;;  %v160_v19 = vmul.f32 %v1059_v22, %v1333_v5 }
  0x20   :  { %v226_v20 = vmax.f32 %v194_v3, 0.0  ;;  %v161_v23 = vmul.f32 %v1062_v35, %v1333_v5  ;;  %v162_v52 = vmul.f32 %v1063_v41, %v1333_v5  ;;  %v1070_v56 = vunpack.c.l.bf16 %v1166_v49 }
  0x21   :  { %v157_v8 = vmul.f32 %v1054_v0, %v1333_v5  ;;  %v1071_v61 = vunpack.c.h.bf16 %v1166_v49  ;;  %v219_v62 = vmax.f32 %v1548_v34, 0.0  ;;  %v1279_v7 = vmov 0.0  }
  0x22   :  { %1223 = vmatmul.mubr.msk.bf16.vlgmr.msra.gmra.mrb[0].mxu0 %vm871_vm13, %v1439_v58  ;;  %vm1612_vm13 = vmneg %vm254_vm6  ;;  %v155_v58 = vmul.f32 %v1050_v50, %v1333_v5  ;;  %vm1949_vm6 = vcmp.ne.f32.partialorder %v1476_v12, %v1476_v12  ;;  %v912_v12 = vpack.c.bf16 %v224_v6, %v223_v63  ;;  %v199_v53 = vadd.f32 %v1344_v10, %v161_v23 }
  0x23   :  { %1226 = vmatprep.mubr.msk.bf16.mxu0 %vm876_vm11, %v877_v18  ;;  %vm255_vm11 = vcmp.ne.f32.partialorder %v1046_v36, %v1046_v36  ;;  %vm906_vm12 = vmpackc.low %vm1612_vm13, %vm1622_vm0  ;;  %vm1946_vm0 = vcmp.ne.f32.partialorder %v1488_v16, %v1488_v16  ;;  %vm257_vm13 = vcmp.ne.f32.partialorder %v1050_v50, %v1050_v50  ;;  %v158_v16 = vmul.f32 %v1055_v4, %v1333_v5  ;;  %v1165_v36 = vld [vmem:[%s1904_s0 + $0x70] sm:$0xff]  }
  0x24   :  { %v193_v2 = vadd.f32 %v1344_v10, %v155_v58  ;;  %vm1653_vm15 = vmneg %vm1946_vm0  ;;  %1238 = vmatprep.mubr.msk.bf16.mxu1 %vm906_vm12, %v907_v1  ;;  %v195_v21 = vadd.f32 %v1344_v10, %v157_v8  ;;  %vm1955_vm12 = vcmp.ne.f32.partialorder %v1051_v51, %v1051_v51  ;;  %v1066_v45 = vunpack.c.l.bf16 %v1165_v36  ;;  %61 = vst [vmem:[%s1907_s5] sm:$0x1] %v1279_v7 }
  0x25   :  { %vm1660_vm7 = vmneg %vm1949_vm6  ;;  %v196_v32 = vadd.f32 %v1344_v10, %v158_v16  ;;  %v1067_v46 = vunpack.c.h.bf16 %v1165_v36  ;;  %v897_v50 = vpack.c.bf16 %v218_v40, %v217_v39  ;;  %v200_v55 = vadd.f32 %v1344_v10, %v162_v52  ;;  %62 = vst [vmem:[%s1908_s6] sm:$0x1] %v1279_v7 }
  0x26   :  { %vm1665_vm14 = vmneg %vm255_vm11  ;;  %v225_v18 = vmax.f32 %v193_v2, 0.0  ;;  %v227_v14 = vmax.f32 %v195_v21, 0.0  ;;  %v163_v25 = vmul.f32 %v1066_v45, %v1333_v5  ;;  %v220_v63 = vmax.f32 %v1607_v48, 0.0 }
  0x27   :  { %vm911_vm0 = vmpackc.low %vm1638_vm5, %vm1665_vm14  ;;  %vm260_vm14 = vcmp.ne.f32.partialorder %v1055_v4, %v1055_v4  ;;  %vm259_vm5 = vcmp.ne.f32.partialorder %v1054_v0, %v1054_v0  ;;  %v228_v37 = vmax.f32 %v196_v32, 0.0  ;;  %v164_v39 = vmul.f32 %v1067_v46, %v1333_v5 }
  0x28   :  { %vm1954_vm11 = vmpackc.low %vm1479_vm1, %vm1496_vm3  ;;  %v917_v31 = vpack.c.bf16 %v226_v20, %v225_v18  ;;  %1239 = vmatmul.mubr.msk.bf16.vlgmr.msra.gmra.mrb[0].mxu1 %vm911_vm0, %v912_v12  ;;  %v201_v59 = vadd.f32 %v1344_v10, %v163_v25  ;;  %v231_v0 = vmax.f32 %v199_v53, 0.0  ;;  %v165_v34 = vmul.f32 %v1070_v56, %v1333_v5 }
  0x29   :  { %vm1683_vm6 = vmneg %vm1955_vm12  ;;  %vm262_vm12 = vcmp.ne.f32.partialorder %v1059_v22, %v1059_v22  ;;  %v922_v54 = vpack.c.bf16 %v228_v37, %v227_v14  ;;  %v202_v60 = vadd.f32 %v1344_v10, %v164_v39  ;;  %v166_v38 = vmul.f32 %v1071_v61, %v1333_v5 }
  0x2a   :  { %1227 = vmatmul.mubr.msk.bf16.gmra.mrb[4].mxu0 %vm1954_vm11, %v1520_v27  ;;  %vm1958_vm1 = vmpackc.low %vm1503_vm4, %vm1525_vm8  ;;  %v197_v27 = vadd.f32 %v1344_v10, %v159_v26  ;;  %v233_v47 = vmax.f32 %v201_v59, 0.0  ;;  %v902_v48 = vpack.c.bf16 %v220_v63, %v219_v62  ;;  %v203_v2 = vadd.f32 %v1344_v10, %v165_v34 }
  0x2b   :  { %1230 = vmatprep.mubr.msk.bf16.mxu0 %vm1958_vm1, %v1529_v29  ;;  %vm915_vm3 = vmneg %vm257_vm13  ;;  %v198_v29 = vadd.f32 %v1344_v10, %v160_v19  ;;  %vm261_vm13 = vcmp.ne.f32.partialorder %v1058_v9, %v1058_v9  ;;  %v234_v44 = vmax.f32 %v202_v60, 0.0  ;;  %v204_v3 = vadd.f32 %v1344_v10, %v166_v38 }
  0x2c   :  { %vm916_vm11 = vmpackc.low %vm1683_vm6, %vm915_vm3  ;;  %v229_v43 = vmax.f32 %v197_v27, 0.0  ;;  %vm1967_vm3 = vnez %v1934_v42  ;;  %v235_v4 = vmax.f32 %v203_v2, 0.0 }
  0x2d   :  { %1242 = vmatprep.mubr.msk.bf16.mxu1 %vm916_vm11, %v917_v31  ;;  %vm1704_vm4 = vmneg %vm260_vm14  ;;  %v230_v24 = vmax.f32 %v198_v29, 0.0  ;;  %vm264_vm14 = vcmp.ne.f32.partialorder %v1063_v41, %v1063_v41  ;;  %v937_v5 = vpack.c.bf16 %v234_v44, %v233_v47  ;;  %v236_v6 = vmax.f32 %v204_v3, 0.0 }
  0x2e   :  { %vm1717_vm8 = vmneg %vm259_vm5 }
  0x2f   :  { %vm921_vm0 = vmpackc.low %vm1704_vm4, %vm1717_vm8  ;;  %v927_v58 = vpack.c.bf16 %v230_v24, %v229_v43  ;;  %v942_v10 = vpack.c.bf16 %v236_v6, %v235_v4 }
  0x30   :  { %vm1730_vm6 = vmneg %vm262_vm12  ;;  %vm263_vm12 = vcmp.ne.f32.partialorder %v1062_v35, %v1062_v35  ;;  %1243 = vmatmul.mubr.msk.bf16.gmra.mrb[4].mxu1 %vm921_vm0, %v922_v54 }
  0x31   :  { %vm1735_vm1 = vmneg %vm261_vm13 }
  0x32   :  { %vm1968_vm5 = vmpackc.low %vm1561_vm2, %vm1967_vm3 }
  0x33   :  { %1231 = vmatmul.mubr.msk.bf16.gmra.mrb[8].mxu0 %vm1968_vm5, %v1545_v33  ;;  %vm926_vm11 = vmpackc.low %vm1730_vm6, %vm1735_vm1  ;;  %v232_v33 = vmax.f32 %v200_v55, 0.0  ;;  %vm266_vm6 = vcmp.ne.f32.partialorder %v1067_v46, %v1067_v46  ;;  %vm267_vm5 = vcmp.ne.f32.partialorder %v1070_v56, %v1070_v56 }
  0x34   :  { %vm1969_vm13 = vmpackc.low %vm1586_vm9, %vm1602_vm10  ;;  %1246 = vmatprep.mubr.msk.bf16.mxu1 %vm926_vm11, %v927_v58  ;;  %vm265_vm10 = vcmp.ne.f32.partialorder %v1066_v45, %v1066_v45 }
  0x35   :  { %1234 = vmatprep.mubr.msk.bf16.mxu0 %vm1969_vm13, %v897_v50  ;;  %vm901_vm2 = vmpackc.low %vm1653_vm15, %vm1660_vm7  ;;  %v932_v1 = vpack.c.bf16 %v232_v33, %v231_v0 }
  0x36   :  { %vm1770_vm9 = vmneg %vm264_vm14  ;;  %vm268_vm14 = vcmp.ne.f32.partialorder %v1071_v61, %v1071_v61 }
  0x37   :  { %vm930_vm1 = vmneg %vm263_vm12 }
  0x38   :  { %vm934_vm3 = vmneg %vm266_vm6 }
  0x39   :  { %vm935_vm4 = vmneg %vm265_vm10 }
  0x3a   :  { %vm931_vm8 = vmpackc.low %vm1770_vm9, %vm930_vm1 }
  0x3b   :  { %vm936_vm0 = vmpackc.low %vm934_vm3, %vm935_vm4  ;;  %1235 = vmatmul.mubr.msk.bf16.gmra.mrb[12].mxu0 %vm901_vm2, %v902_v48  ;;  %1247 = vmatmul.mubr.msk.bf16.gmra.mrb[8].mxu1 %vm931_vm8, %v932_v1 }
  0x3c   :  { %1250 = vmatprep.mubr.msk.bf16.mxu1 %vm936_vm0, %v937_v5  ;;  %vm939_vm11 = vmneg %vm268_vm14 }
  0x3d   :  { %vm940_vm12 = vmneg %vm267_vm5 }
  0x3e   :  { %vm941_vm13 = vmpackc.low %vm939_vm11, %vm940_vm12 }
  0x43   :  { %1251 = vmatmul.mubr.msk.bf16.gmra.mrb[12].mxu1 %vm941_vm13, %v942_v10 }
  0xf5   :  { %v1224_v8 = vpop.f32.mrb[0].mxu0 }
  0xf6   :  { %v415_v9 = vpop.f32.mrb[1].mxu0  ;;  %v745_v12 = vmul.f32 %v1224_v8, %v1224_v8 }
  0xf7   :  { %v1225_v11 = vpop.f32.mrb[2].mxu0  ;;  %v743_v17 = vmul.f32 %v415_v9, %v415_v9 }
  0xf8   :  { %v1080_v13 = vpack.c.bf16 %v1225_v11, %v1224_v8  ;;  %v418_v15 = vpop.f32.mrb[3].mxu0  ;;  %v746_v26 = vmul.f32 %v1225_v11, %v1225_v11 }
  0xf9   :  { %v1075_v18 = vpack.c.bf16 %v418_v15, %v415_v9  ;;  %v703_v20 = vadd.f32 %v418_v15, %v415_v9  ;;  %v744_v16 = vmul.f32 %v418_v15, %v418_v15 }
  0xfa   :  { %1167 = vst [vmem:[%s1909_s4 + $0x8] sm:$0xff] %v1080_v13  }
  0xfb   :  { %1076 = vst [vmem:[%s1909_s4] sm:$0xff] %v1075_v18   ;;  %v704_v21 = vadd.f32 %v1224_v8, %v703_v20  ;;  %v775_v22 = vadd.f32 %v744_v16, %v743_v17  ;;  %v1795_v36 = vpop.f32.mrb[0].mxu1 }
  0xfc   :  { %v1797_v41 = vpop.f32.mrb[1].mxu1 }
  0xfd   :  { %v776_v30 = vadd.f32 %v775_v22, %v745_v12  ;;  %v1228_v31 = vpop.f32.mrb[4].mxu0  ;;  %v705_v32 = vadd.f32 %v1225_v11, %v704_v21  ;;  %v1799_v29 = vpop.f32.mrb[2].mxu1 }
  0xfe   :  { %v431_v35 = vpop.f32.mrb[5].mxu0  ;;  %v1801_v50 = vpop.f32.mrb[3].mxu1  ;;  %v1120_v51 = vpack.c.bf16 %v1799_v29, %v1795_v36  ;;  %v749_v53 = vmul.f32 %v1228_v31, %v1228_v31 }
  0xff   :  { %v706_v14 = vadd.f32 %v705_v32, %v431_v35  ;;  %v747_v19 = vmul.f32 %v431_v35, %v431_v35  ;;  %v777_v27 = vadd.f32 %v776_v30, %v746_v26  ;;  %v1229_v37 = vpop.f32.mrb[6].mxu0  ;;  %v1115_v52 = vpack.c.bf16 %v1801_v50, %v1797_v41 }
 0x100   :  { %v1090_v23 = vpack.c.bf16 %v1229_v37, %v1228_v31  ;;  %v434_v28 = vpop.f32.mrb[7].mxu0  ;;  %1175 = vst [vmem:[%s1909_s4 + $0x48] sm:$0xff] %v1120_v51   ;;  %v750_v25 = vmul.f32 %v1229_v37, %v1229_v37 }
 0x101   :  { %v778_v43 = vadd.f32 %v777_v27, %v747_v19  ;;  %v1085_v45 = vpack.c.bf16 %v434_v28, %v431_v35  ;;  %v707_v46 = vadd.f32 %v706_v14, %v434_v28  ;;  %v748_v49 = vmul.f32 %v434_v28, %v434_v28  ;;  %1174 = vst [vmem:[%s1909_s4 + $0x40] sm:$0xff] %v1115_v52  }
 0x102   :  { %1169 = vst [vmem:[%s1909_s4 + $0x18] sm:$0xff] %v1090_v23  }
 0x103   :  { %1168 = vst [vmem:[%s1909_s4 + $0x10] sm:$0xff] %v1085_v45   ;;  %v708_v54 = vadd.f32 %v1228_v31, %v707_v46  ;;  %v779_v24 = vadd.f32 %v778_v43, %v748_v49  ;;  %v1819_v57 = vpop.f32.mrb[4].mxu1  ;;  %v759_v43 = vmul.f32 %v1797_v41, %v1797_v41 }
 0x104   :  { %v1821_v62 = vpop.f32.mrb[5].mxu1 }
 0x105   :  { %v780_v39 = vadd.f32 %v779_v24, %v749_v53  ;;  %v709_v55 = vadd.f32 %v1229_v37, %v708_v54  ;;  %v1823_v33 = vpop.f32.mrb[6].mxu1  ;;  %v760_v24 = vmul.f32 %v1801_v50, %v1801_v50 }
 0x106   :  { %v1232_v40 = vpop.f32.mrb[8].mxu0  ;;  %v1825_v44 = vpop.f32.mrb[7].mxu1  ;;  %v1130_v48 = vpack.c.bf16 %v1823_v33, %v1819_v57 }
 0x107   :  { %v447_v56 = vpop.f32.mrb[9].mxu0  ;;  %v781_v60 = vadd.f32 %v780_v39, %v750_v25  ;;  %v1125_v1 = vpack.c.bf16 %v1825_v44, %v1821_v62  ;;  %v753_v2 = vmul.f32 %v1232_v40, %v1232_v40 }
 0x108   :  { %v710_v58 = vadd.f32 %v709_v55, %v447_v56  ;;  %v751_v59 = vmul.f32 %v447_v56, %v447_v56  ;;  %v1233_v61 = vpop.f32.mrb[10].mxu0  ;;  %1177 = vst [vmem:[%s1909_s4 + $0x58] sm:$0xff] %v1130_v48   ;;  %v761_v55 = vmul.f32 %v1795_v36, %v1795_v36 }
 0x109   :  { %v1100_v63 = vpack.c.bf16 %v1233_v61, %v1232_v40  ;;  %v450_v0 = vpop.f32.mrb[11].mxu0  ;;  %1176 = vst [vmem:[%s1909_s4 + $0x50] sm:$0xff] %v1125_v1   ;;  %v754_v4 = vmul.f32 %v1233_v61, %v1233_v61 }
 0x10a   :  { %v782_v34 = vadd.f32 %v781_v60, %v751_v59  ;;  %v1095_v38 = vpack.c.bf16 %v450_v0, %v447_v56  ;;  %v711_v42 = vadd.f32 %v710_v58, %v450_v0  ;;  %v752_v47 = vmul.f32 %v450_v0, %v450_v0 }
 0x10b   :  { %1171 = vst [vmem:[%s1909_s4 + $0x28] sm:$0xff] %v1100_v63   ;;  %v763_v60 = vmul.f32 %v1821_v62, %v1821_v62 }
 0x10c   :  { %1170 = vst [vmem:[%s1909_s4 + $0x20] sm:$0xff] %v1095_v38   ;;  %v712_v3 = vadd.f32 %v1232_v40, %v711_v42  ;;  %v783_v5 = vadd.f32 %v782_v34, %v752_v47  ;;  %v764_v34 = vmul.f32 %v1825_v44, %v1825_v44  ;;  %v765_v38 = vmul.f32 %v1819_v57, %v1819_v57 }
 0x10e   :  { %v784_v6 = vadd.f32 %v783_v5, %v753_v2  ;;  %v1236_v10 = vpop.f32.mrb[12].mxu0  ;;  %v713_v7 = vadd.f32 %v1233_v61, %v712_v3  ;;  %v1843_v9 = vpop.f32.mrb[8].mxu1 }
 0x10f   :  { %v463_v8 = vpop.f32.mrb[13].mxu0  ;;  %v511_v18 = vpop.f32.mrb[9].mxu1  ;;  %v757_v14 = vmul.f32 %v1236_v10, %v1236_v10 }
 0x110   :  { %v714_v11 = vadd.f32 %v713_v7, %v463_v8  ;;  %v755_v13 = vmul.f32 %v463_v8, %v463_v8  ;;  %v785_v15 = vadd.f32 %v784_v6, %v754_v4  ;;  %v1237_v17 = vpop.f32.mrb[14].mxu0  ;;  %v1249_v12 = vpop.f32.mrb[10].mxu1 }
 0x111   :  { %v1110_v20 = vpack.c.bf16 %v1237_v17, %v1236_v10  ;;  %v466_v16 = vpop.f32.mrb[15].mxu0  ;;  %v514_v31 = vpop.f32.mrb[11].mxu1  ;;  %v1140_v32 = vpack.c.bf16 %v1249_v12, %v1843_v9  ;;  %v758_v37 = vmul.f32 %v1237_v17, %v1237_v17 }
 0x112   :  { %v786_v21 = vadd.f32 %v785_v15, %v755_v13  ;;  %v1105_v22 = vpack.c.bf16 %v466_v16, %v463_v8  ;;  %v715_v26 = vadd.f32 %v714_v11, %v466_v16  ;;  %v756_v30 = vmul.f32 %v466_v16, %v466_v16 }
 0x113   :  { %1173 = vst [vmem:[%s1909_s4 + $0x38] sm:$0xff] %v1110_v20   ;;  %v1135_v35 = vpack.c.bf16 %v514_v31, %v511_v18  ;;  %1179 = vst [vmem:[%s1909_s4 + $0x68] sm:$0xff] %v1140_v32   ;;  %v768_v6 = vmul.f32 %v514_v31, %v514_v31 }
 0x114   :  { %1172 = vst [vmem:[%s1909_s4 + $0x30] sm:$0xff] %v1105_v22   ;;  %v716_v19 = vadd.f32 %v1236_v10, %v715_v26  ;;  %v787_v27 = vadd.f32 %v786_v21, %v756_v30 }
 0x115   :  { %1178 = vst [vmem:[%s1909_s4 + $0x60] sm:$0xff] %v1135_v35  }
 0x116   :  { %v788_v23 = vadd.f32 %v787_v27, %v757_v14  ;;  %v717_v28 = vadd.f32 %v1237_v17, %v716_v19  ;;  %v1252_v45 = vpop.f32.mrb[12].mxu1 }
 0x117   :  { %v527_v51 = vpop.f32.mrb[13].mxu1 }
 0x118   :  { %v718_v46 = vadd.f32 %v717_v28, %v1797_v41  ;;  %v789_v49 = vadd.f32 %v788_v23, %v758_v37  ;;  %v1253_v52 = vpop.f32.mrb[14].mxu1  ;;  %v762_v41 = vmul.f32 %v1799_v29, %v1799_v29  ;;  %v771_v13 = vmul.f32 %v527_v51, %v527_v51 }
 0x119   :  { %v1150_v25 = vpack.c.bf16 %v1253_v52, %v1252_v45  ;;  %v530_v39 = vpop.f32.mrb[15].mxu1  ;;  %v774_v26 = vmul.f32 %v1253_v52, %v1253_v52 }
 0x11a   :  { %v790_v53 = vadd.f32 %v789_v49, %v759_v43  ;;  %v719_v54 = vadd.f32 %v718_v46, %v1801_v50  ;;  %v1145_v40 = vpack.c.bf16 %v530_v39, %v527_v51  ;;  %v772_v16 = vmul.f32 %v530_v39, %v530_v39  ;;  %v702_v43 = vld [vmem:[%s1907_s5] sm:$0x1] }
 0x11b   :  { %1181 = vst [vmem:[%s1909_s4 + $0x78] sm:$0xff] %v1150_v25   ;;  %v742_v49 = vld [vmem:[%s1908_s6] sm:$0x1] }
 0x11c   :  { %v720_v56 = vadd.f32 %v1795_v36, %v719_v54  ;;  %v791_v58 = vadd.f32 %v790_v53, %v760_v24  ;;  %1180 = vst [vmem:[%s1909_s4 + $0x70] sm:$0xff] %v1145_v40  }
 0x11e   :  { %v792_v50 = vadd.f32 %v791_v58, %v761_v55  ;;  %v721_v59 = vadd.f32 %v1799_v29, %v720_v56  ;;  %v766_v29 = vmul.f32 %v1823_v33, %v1823_v33 }
 0x120   :  { %v722_v36 = vadd.f32 %v721_v59, %v1821_v62  ;;  %v793_v61 = vadd.f32 %v792_v50, %v762_v41  ;;  %v767_v62 = vmul.f32 %v511_v18, %v511_v18 }
 0x122   :  { %v794_v63 = vadd.f32 %v793_v61, %v763_v60  ;;  %v723_v0 = vadd.f32 %v722_v36, %v1825_v44  ;;  %v769_v44 = vmul.f32 %v1843_v9, %v1843_v9 }
 0x124   :  { %v724_v42 = vadd.f32 %v1819_v57, %v723_v0  ;;  %v795_v47 = vadd.f32 %v794_v63, %v764_v34  ;;  %v770_v57 = vmul.f32 %v1249_v12, %v1249_v12 }
 0x126   :  { %v796_v48 = vadd.f32 %v795_v47, %v765_v38  ;;  %v725_v1 = vadd.f32 %v1823_v33, %v724_v42 }
 0x128   :  { %v726_v2 = vadd.f32 %v725_v1, %v511_v18  ;;  %v797_v3 = vadd.f32 %v796_v48, %v766_v29  ;;  %v773_v18 = vmul.f32 %v1252_v45, %v1252_v45 }
 0x12a   :  { %v798_v5 = vadd.f32 %v797_v3, %v767_v62  ;;  %v727_v4 = vadd.f32 %v726_v2, %v514_v31 }
 0x12c   :  { %v728_v10 = vadd.f32 %v1843_v9, %v727_v4  ;;  %v799_v7 = vadd.f32 %v798_v5, %v768_v6 }
 0x12e   :  { %v800_v8 = vadd.f32 %v799_v7, %v769_v44  ;;  %v729_v11 = vadd.f32 %v1249_v12, %v728_v10 }
 0x130   :  { %v730_v15 = vadd.f32 %v729_v11, %v527_v51  ;;  %v801_v17 = vadd.f32 %v800_v8, %v770_v57 }
 0x132   :  { %v802_v20 = vadd.f32 %v801_v17, %v771_v13  ;;  %v731_v33 = vadd.f32 %v730_v15, %v530_v39 }
 0x134   :  { %v732_v21 = vadd.f32 %v1252_v45, %v731_v33  ;;  %v803_v22 = vadd.f32 %v802_v20, %v772_v16 }
 0x136   :  { %v733_v30 = vadd.f32 %v1253_v52, %v732_v21  ;;  %v804_v31 = vadd.f32 %v803_v22, %v773_v18 }
 0x138   :  { %v734_v32 = vrot.slane %v733_v30, 4  ;;  %v805_v35 = vadd.f32 %v804_v31, %v774_v26 }
 0x13a   :  { %v735_v14 = vadd.f32 %v734_v32, %v733_v30  ;;  %v806_v9 = vrot.slane %v805_v35, 4 }
 0x13c   :  { %v736_v19 = vrot.slane %v735_v14, 2  ;;  %v807_v27 = vadd.f32 %v806_v9, %v805_v35 }
 0x13e   :  { %v737_v37 = vadd.f32 %v736_v19, %v735_v14  ;;  %v808_v12 = vrot.slane %v807_v27, 2 }
 0x140   :  { %v738_v23 = vrot.slane %v737_v37, 1  ;;  %v809_v28 = vadd.f32 %v808_v12, %v807_v27 }
 0x142   :  { %v739_v46 = vadd.f32 %v738_v23, %v737_v37  ;;  %v810_v45 = vrot.slane %v809_v28, 1 }
 0x144   :  { %v740_v51 = vadd.f32 %v739_v46, %v702_v43  ;;  %v811_v52 = vadd.f32 %v810_v45, %v809_v28 }
 0x146   :  { %741 = vst [vmem:[%s1907_s5] sm:$0x1] %v740_v51  ;;  %v812_v53 = vadd.f32 %v811_v52, %v742_v49 }
 0x148   :  { %813 = vst [vmem:[%s1908_s6] sm:$0x1] %v812_v53 }

// kernel: preact_block_forward.5
= control target key start
LH: loop header
LB: loop body
LE: loop exit
PB: predicated region body
PF: predicated region fallthrough
CT: control target
= control target key end

     0   :  { %s1312_s3 = inlined_call_operand.vmem [shape: bf16[128,128], index: 3, kind: input, shape index: {}]   ;;  %s1313_s0 = inlined_call_operand.vmem [shape: bf16[256,128], index: 0, kind: input, shape index: {}]   ;;  %s1314_s1 = inlined_call_operand.vmem [shape: f32[1,128], index: 1, kind: input, shape index: {}]   ;;  %s1315_s2 = inlined_call_operand.vmem [shape: f32[1,128], index: 2, kind: input, shape index: {}]   ;;  %s1316_s4 = inlined_call_operand.vmem [shape: f32[256,128], index: 4, kind: output, shape index: {}]  }
   0x1   :  { %v790_v0 = vld [vmem:[%s1312_s3] sm:$0xff]   ;;  %v791_v1 = vld [vmem:[%s1312_s3 + $0x8] sm:$0xff]   ;;  %v792_v2 = vld [vmem:[%s1312_s3 + $0x10] sm:$0xff]  }
   0x2   :  { %726 = vmatprep.subr.bf16.mxu0 %v790_v0  ;;  %774 = vmatprep.subr.bf16.mxu1 %v790_v0  ;;  %v793_v3 = vld [vmem:[%s1312_s3 + $0x18] sm:$0xff]   ;;  %v624_v4 = vld [vmem:[%s1313_s0] sm:$0xff]   ;;  %v687_v9 = vld [vmem:[%s1313_s0 + $0x8] sm:$0xff]  }
   0x3   :  { %727 = vmatpush3.bf16.msra.mxu0 %v790_v0  ;;  %782 = vmatpush3.bf16.msra.mxu1 %v790_v0  ;;  %v841_v5 = vld [vmem:[%s1314_s1] ss:$0 sm:$0xff]  ;;  %v625_v6 = vunpack.c.l.bf16 %v624_v4  ;;  %v626_v7 = vunpack.c.h.bf16 %v624_v4  ;;  %v695_v10 = vld [vmem:[%s1313_s0 + $0x48] sm:$0xff]   ;;  %v857_v14 = vunpack.c.l.bf16 %v687_v9  ;;  %v630_v15 = vunpack.c.h.bf16 %v687_v9  ;;  %v688_v40 = vld [vmem:[%s1313_s0 + $0x10] sm:$0xff]  }
   0x4   :  { %728 = vmatprep.subr.bf16.mxu0 %v791_v1  ;;  %775 = vmatprep.subr.bf16.mxu1 %v791_v1  ;;  %v694_v8 = vld [vmem:[%s1313_s0 + $0x40] sm:$0xff]   ;;  %v861_v18 = vunpack.c.l.bf16 %v695_v10  ;;  %v662_v22 = vunpack.c.h.bf16 %v695_v10  ;;  %v795_v34 = vld [vmem:[%s1312_s3 + $0x28] sm:$0xff]   ;;  %v696_v44 = vld [vmem:[%s1313_s0 + $0x50] sm:$0xff]   ;;  %v633_v52 = vunpack.c.l.bf16 %v688_v40  ;;  %v634_v53 = vunpack.c.h.bf16 %v688_v40 }
   0x5   :  { %v855_v11 = vld [vmem:[%s1315_s2] ss:$0 sm:$0xff]  ;;  %v657_v12 = vunpack.c.l.bf16 %v694_v8  ;;  %v658_v13 = vunpack.c.h.bf16 %v694_v8  ;;  %v90_v16 = vmul.f32 %v625_v6, %v841_v5  ;;  %v91_v17 = vmul.f32 %v626_v7, %v841_v5  ;;  %v689_v45 = vld [vmem:[%s1313_s0 + $0x18] sm:$0xff]   ;;  %v796_v54 = vld [vmem:[%s1312_s3 + $0x30] sm:$0xff]  }
   0x6   :  { %vm192_vm0 = vcmp.ne.f32.partialorder %v625_v6, %v625_v6  ;;  %v794_v19 = vld [vmem:[%s1312_s3 + $0x20] sm:$0xff]   ;;  %vm193_vm1 = vcmp.ne.f32.partialorder %v626_v7, %v626_v7  ;;  %v92_v29 = vmul.f32 %v857_v14, %v841_v5  ;;  %v93_v30 = vmul.f32 %v630_v15, %v841_v5  ;;  %v697_v0 = vld [vmem:[%s1313_s0 + $0x58] sm:$0xff]  }
   0x7   :  { %729 = vmatpush3.bf16.msra.mxu0 %v791_v1  ;;  %783 = vmatpush3.bf16.msra.mxu1 %v791_v1  ;;  %v106_v20 = vmul.f32 %v657_v12, %v841_v5  ;;  %v107_v21 = vmul.f32 %v658_v13, %v841_v5  ;;  %v128_v23 = vadd.f32 %v855_v11, %v90_v16  ;;  %vm870_vm2 = vmneg %vm192_vm0  ;;  %v665_v56 = vunpack.c.l.bf16 %v696_v44  ;;  %v797_v9 = vld [vmem:[%s1312_s3 + $0x38] sm:$0xff]  }
   0x8   :  { %730 = vmatprep.subr.bf16.mxu0 %v792_v2  ;;  %776 = vmatprep.subr.bf16.mxu1 %v792_v2  ;;  %v129_v24 = vadd.f32 %v855_v11, %v91_v17  ;;  %vm208_vm3 = vcmp.ne.f32.partialorder %v657_v12, %v657_v12  ;;  %vm209_vm4 = vcmp.ne.f32.partialorder %v658_v13, %v658_v13  ;;  %vm874_vm5 = vmneg %vm193_vm1  ;;  %v666_v57 = vunpack.c.h.bf16 %v696_v44  ;;  %v701_v37 = vld [vmem:[%s1313_s0 + $0x78] sm:$0xff]  }
   0x9   :  { %v144_v27 = vadd.f32 %v855_v11, %v106_v20  ;;  %v145_v28 = vadd.f32 %v855_v11, %v107_v21  ;;  %v160_v31 = vmax.f32 %v128_v23, 0.0  ;;  %vm883_vm6 = vmneg %vm209_vm4  ;;  %vm194_vm7 = vcmp.ne.f32.partialorder %v857_v14, %v857_v14 }
   0xa   :  { %v161_v32 = vmax.f32 %v129_v24, 0.0  ;;  %vm195_vm8 = vcmp.ne.f32.partialorder %v630_v15, %v630_v15  ;;  %vm893_vm9 = vmneg %vm208_vm3  ;;  %v130_v38 = vadd.f32 %v855_v11, %v92_v29  ;;  %v131_v39 = vadd.f32 %v855_v11, %v93_v30 }
   0xb   :  { %731 = vmatpush3.bf16.msra.mxu0 %v792_v2  ;;  %784 = vmatpush3.bf16.msra.mxu1 %v792_v2  ;;  %v176_v35 = vmax.f32 %v144_v27, 0.0  ;;  %v177_v36 = vmax.f32 %v145_v28, 0.0  ;;  %vm545_vm10 = vmpackc.low %vm874_vm5, %vm870_vm2  ;;  %v108_v42 = vmul.f32 %v861_v18, %v841_v5  ;;  %v109_v43 = vmul.f32 %v662_v22, %v841_v5 }
   0xc   :  { %732 = vmatprep.subr.bf16.mxu0 %v793_v3  ;;  %777 = vmatprep.subr.bf16.mxu1 %v793_v3  ;;  %v546_v41 = vpack.c.bf16 %v161_v32, %v160_v31  ;;  %vm210_vm11 = vcmp.ne.f32.partialorder %v861_v18, %v861_v18  ;;  %vm585_vm12 = vmpackc.low %vm883_vm6, %vm893_vm9  ;;  %v162_v47 = vmax.f32 %v130_v38, 0.0  ;;  %v163_v48 = vmax.f32 %v131_v39, 0.0  ;;  %v698_v32 = vld [vmem:[%s1313_s0 + $0x60] sm:$0xff]  }
   0xd   :  { %v586_v46 = vpack.c.bf16 %v177_v36, %v176_v35  ;;  %vm211_vm13 = vcmp.ne.f32.partialorder %v662_v22, %v662_v22  ;;  %vm922_vm14 = vmneg %vm195_vm8  ;;  %v146_v50 = vadd.f32 %v855_v11, %v108_v42  ;;  %v147_v51 = vadd.f32 %v855_v11, %v109_v43 }
   0xe   :  { %vm934_vm15 = vmneg %vm194_vm7  ;;  %v938_v58 = vunpack.c.l.bf16 %v689_v45  ;;  %742 = vmatprep.mubr.msk.bf16.mxu0 %vm545_vm10, %v546_v41  ;;  %v94_v62 = vmul.f32 %v633_v52, %v841_v5  ;;  %v95_v63 = vmul.f32 %v634_v53, %v841_v5  ;;  %vm196_vm2 = vcmp.ne.f32.partialorder %v633_v52, %v633_v52 }
   0xf   :  { %733 = vmatpush3.bf16.msra.mxu0 %v793_v3  ;;  %785 = vmatpush3.bf16.msra.mxu1 %v793_v3  ;;  %v178_v59 = vmax.f32 %v146_v50, 0.0  ;;  %v179_v60 = vmax.f32 %v147_v51, 0.0  ;;  %vm951_vm0 = vmneg %vm211_vm13  ;;  %vm197_vm3 = vcmp.ne.f32.partialorder %v634_v53, %v634_v53  ;;  %v110_v2 = vmul.f32 %v665_v56, %v841_v5  ;;  %v699_v53 = vld [vmem:[%s1313_s0 + $0x68] sm:$0xff]  }
  0x10   :  { %734 = vmatprep.subr.bf16.mxu0 %v794_v19  ;;  %778 = vmatprep.subr.bf16.mxu1 %v794_v19  ;;  %vm963_vm1 = vmneg %vm210_vm11  ;;  %v111_v3 = vmul.f32 %v666_v57, %v841_v5  ;;  %v973_v4 = vpack.c.bf16 %v163_v48, %v162_v47  ;;  %v132_v6 = vadd.f32 %v855_v11, %v94_v62  ;;  %v638_v8 = vunpack.c.h.bf16 %v689_v45  ;;  %v691_v47 = vld [vmem:[%s1313_s0 + $0x28] sm:$0xff]  }
  0x11   :  { %758 = vmatprep.mubr.msk.bf16.mxu1 %vm585_vm12, %v586_v46  ;;  %vm550_vm4 = vmpackc.low %vm922_vm14, %vm934_vm15  ;;  %v133_v7 = vadd.f32 %v855_v11, %v95_v63  ;;  %v148_v12 = vadd.f32 %v855_v11, %v110_v2  ;;  %vm212_vm7 = vcmp.ne.f32.partialorder %v665_v56, %v665_v56  ;;  %v669_v14 = vunpack.c.l.bf16 %v697_v0 }
  0x12   :  { %vm984_vm6 = vmneg %vm197_vm3  ;;  %v149_v13 = vadd.f32 %v855_v11, %v111_v3  ;;  %v164_v15 = vmax.f32 %v132_v6, 0.0  ;;  %vm213_vm9 = vcmp.ne.f32.partialorder %v666_v57, %v666_v57  ;;  %v96_v18 = vmul.f32 %v938_v58, %v841_v5 }
  0x13   :  { %735 = vmatpush3.bf16.msra.mxu0 %v794_v19  ;;  %786 = vmatpush3.bf16.msra.mxu1 %v794_v19  ;;  %v165_v16 = vmax.f32 %v133_v7, 0.0  ;;  %vm991_vm8 = vmneg %vm196_vm2  ;;  %v690_v19 = vld [vmem:[%s1313_s0 + $0x20] sm:$0xff]   ;;  %v591_v20 = vpack.c.bf16 %v179_v60, %v178_v59  ;;  %v180_v21 = vmax.f32 %v148_v12, 0.0  ;;  %v97_v23 = vmul.f32 %v638_v8, %v841_v5  ;;  %v692_v7 = vld [vmem:[%s1313_s0 + $0x30] sm:$0xff]  }
  0x14   :  { %736 = vmatprep.subr.bf16.mxu0 %v795_v34  ;;  %779 = vmatprep.subr.bf16.mxu1 %v795_v34  ;;  %v181_v22 = vmax.f32 %v149_v13, 0.0  ;;  %vm1005_vm11 = vmneg %vm213_vm9  ;;  %v134_v25 = vadd.f32 %v855_v11, %v96_v18  ;;  %vm198_vm12 = vcmp.ne.f32.partialorder %v938_v58, %v938_v58  ;;  %vm199_vm13 = vcmp.ne.f32.partialorder %v638_v8, %v638_v8  ;;  %v700_v13 = vld [vmem:[%s1313_s0 + $0x70] sm:$0xff]  }
  0x15   :  { %v670_v26 = vunpack.c.h.bf16 %v697_v0  ;;  %v556_v27 = vpack.c.bf16 %v165_v16, %v164_v15  ;;  %vm1013_vm2 = vmneg %vm212_vm7  ;;  %v135_v29 = vadd.f32 %v855_v11, %v97_v23  ;;  %v112_v30 = vmul.f32 %v669_v14, %v841_v5 }
  0x16   :  { %v641_v31 = vunpack.c.l.bf16 %v690_v19  ;;  %v596_v33 = vpack.c.bf16 %v181_v22, %v180_v21  ;;  %vm1028_vm9 = vmneg %vm199_vm13  ;;  %v642_v39 = vunpack.c.h.bf16 %v690_v19  ;;  %v673_v43 = vunpack.c.l.bf16 %v698_v32 }
  0x17   :  { %737 = vmatpush3.bf16.msra.mxu0 %v795_v34  ;;  %787 = vmatpush3.bf16.msra.mxu1 %v795_v34  ;;  %v166_v34 = vmax.f32 %v134_v25, 0.0  ;;  %v113_v35 = vmul.f32 %v670_v26, %v841_v5  ;;  %vm215_vm7 = vcmp.ne.f32.partialorder %v670_v26, %v670_v26  ;;  %v167_v36 = vmax.f32 %v135_v29, 0.0  ;;  %vm1037_vm3 = vmneg %vm198_vm12 }
  0x18   :  { %738 = vmatprep.subr.bf16.mxu0 %v796_v54  ;;  %780 = vmatprep.subr.bf16.mxu1 %v796_v54  ;;  %v150_v38 = vadd.f32 %v855_v11, %v112_v30  ;;  %v98_v40 = vmul.f32 %v641_v31, %v841_v5  ;;  %v674_v44 = vunpack.c.h.bf16 %v698_v32  ;;  %v99_v45 = vmul.f32 %v642_v39, %v841_v5  ;;  %vm1052_vm12 = vmneg %vm215_vm7 }
  0x19   :  { %v151_v42 = vadd.f32 %v855_v11, %v113_v35  ;;  %v561_v48 = vpack.c.bf16 %v167_v36, %v166_v34  ;;  %vm201_vm13 = vcmp.ne.f32.partialorder %v642_v39, %v642_v39  ;;  %v114_v51 = vmul.f32 %v673_v43, %v841_v5  ;;  %vm1347_vm7 = vmpackc.low %vm951_vm0, %vm963_vm1  ;;  %v693_v34 = vld [vmem:[%s1313_s0 + $0x38] sm:$0xff]  }
  0x1a   :  { %v136_v46 = vadd.f32 %v855_v11, %v98_v40  ;;  %v115_v52 = vmul.f32 %v674_v44, %v841_v5  ;;  %vm1348_vm10 = vcmp.ne.f32.partialorder %v669_v14, %v669_v14  ;;  %v137_v58 = vadd.f32 %v855_v11, %v99_v45  ;;  %vm1351_vm14 = vmpackc.low %vm984_vm6, %vm991_vm8 }
  0x1b   :  { %739 = vmatpush3.bf16.msra.mxu0 %v796_v54  ;;  %788 = vmatpush3.bf16.msra.mxu1 %v796_v54  ;;  %v182_v54 = vmax.f32 %v150_v38, 0.0  ;;  %v183_v56 = vmax.f32 %v151_v42, 0.0  ;;  %vm1073_vm5 = vmneg %vm1348_vm10  ;;  %v152_v55 = vadd.f32 %v855_v11, %v114_v51  ;;  %vm217_vm1 = vcmp.ne.f32.partialorder %v674_v44, %v674_v44 }
  0x1c   :  { %740 = vmatprep.subr.bf16.mxu0 %v797_v9  ;;  %781 = vmatprep.subr.bf16.mxu1 %v797_v9  ;;  %v168_v49 = vmax.f32 %v136_v46, 0.0  ;;  %vm1352_vm15 = vmpackc.low %vm1005_vm11, %vm1013_vm2  ;;  %v153_v59 = vadd.f32 %v855_v11, %v115_v52  ;;  %v645_v60 = vunpack.c.l.bf16 %v691_v47  ;;  %v169_v61 = vmax.f32 %v137_v58, 0.0 }
  0x1d   :  { %vm600_vm0 = vmpackc.low %vm1052_vm12, %vm1073_vm5  ;;  %v646_v63 = vunpack.c.h.bf16 %v691_v47  ;;  %v677_v0 = vunpack.c.l.bf16 %v699_v53  ;;  %v678_v1 = vunpack.c.h.bf16 %v699_v53  ;;  %vm1355_vm6 = vcmp.ne.f32.partialorder %v641_v31, %v641_v31 }
  0x1e   :  { %vm1100_vm8 = vmneg %vm1355_vm6  ;;  %v184_v3 = vmax.f32 %v152_v55, 0.0  ;;  %vm216_vm10 = vcmp.ne.f32.partialorder %v673_v43, %v673_v43  ;;  %v100_v6 = vmul.f32 %v645_v60, %v841_v5  ;;  %v601_v8 = vpack.c.bf16 %v183_v56, %v182_v54 }
  0x1f   :  { %741 = vmatpush3.bf16.msra.mxu0 %v797_v9  ;;  %789 = vmatpush3.bf16.msra.mxu1 %v797_v9  ;;  %v566_v9 = vpack.c.bf16 %v169_v61, %v168_v49  ;;  %v101_v10 = vmul.f32 %v646_v63, %v841_v5  ;;  %v116_v12 = vmul.f32 %v677_v0, %v841_v5  ;;  %vm1118_vm2 = vmneg %vm217_vm1  ;;  %v649_v21 = vunpack.c.l.bf16 %v692_v7 }
  0x20   :  { %v138_v16 = vadd.f32 %v855_v11, %v100_v6  ;;  %v117_v17 = vmul.f32 %v678_v1, %v841_v5  ;;  %v650_v24 = vunpack.c.h.bf16 %v692_v7  ;;  %v681_v25 = vunpack.c.l.bf16 %v700_v13  ;;  %vm1362_vm1 = vmpackc.low %vm1028_vm9, %vm1037_vm3 }
  0x21   :  { %v139_v19 = vadd.f32 %v855_v11, %v101_v10  ;;  %v102_v29 = vmul.f32 %v649_v21, %v841_v5  ;;  %vm218_vm5 = vcmp.ne.f32.partialorder %v677_v0, %v677_v0  ;;  %vm204_vm12 = vcmp.ne.f32.partialorder %v649_v21, %v649_v21 }
  0x22   :  { %743 = vmatmul.mubr.msk.bf16.vlgmr.msra.gmra.mrb[0].mxu0 %vm550_vm4, %v973_v4  ;;  %759 = vmatmul.mubr.msk.bf16.vlgmr.msra.gmra.mrb[0].mxu1 %vm1347_vm7, %v591_v20  ;;  %vm1095_vm4 = vmneg %vm201_vm13  ;;  %v185_v4 = vmax.f32 %v153_v59, 0.0  ;;  %vm203_vm13 = vcmp.ne.f32.partialorder %v646_v63, %v646_v63  ;;  %v154_v20 = vadd.f32 %v855_v11, %v116_v12  ;;  %v170_v22 = vmax.f32 %v138_v16, 0.0 }
  0x23   :  { %746 = vmatprep.mubr.msk.bf16.mxu0 %vm1351_vm14, %v556_v27  ;;  %762 = vmatprep.mubr.msk.bf16.mxu1 %vm1352_vm15, %v596_v33  ;;  %vm565_vm11 = vmpackc.low %vm1095_vm4, %vm1100_vm8  ;;  %vm202_vm14 = vcmp.ne.f32.partialorder %v645_v60, %v645_v60  ;;  %v155_v23 = vadd.f32 %v855_v11, %v117_v17  ;;  %v171_v26 = vmax.f32 %v139_v19, 0.0  ;;  %v103_v32 = vmul.f32 %v650_v24, %v841_v5 }
  0x24   :  { %v606_v15 = vpack.c.bf16 %v185_v4, %v184_v3  ;;  %vm1124_vm7 = vmneg %vm216_vm10  ;;  %v186_v28 = vmax.f32 %v154_v20, 0.0  ;;  %vm219_vm10 = vcmp.ne.f32.partialorder %v678_v1, %v678_v1  ;;  %v682_v33 = vunpack.c.h.bf16 %v700_v13 }
  0x25   :  { %vm605_vm15 = vmpackc.low %vm1118_vm2, %vm1124_vm7  ;;  %v187_v31 = vmax.f32 %v155_v23, 0.0  ;;  %v140_v35 = vadd.f32 %v855_v11, %v102_v29  ;;  %v118_v36 = vmul.f32 %v681_v25, %v841_v5  ;;  %v571_v38 = vpack.c.bf16 %v171_v26, %v170_v22 }
  0x26   :  { %vm1145_vm6 = vmneg %vm203_vm13  ;;  %v141_v41 = vadd.f32 %v855_v11, %v103_v32  ;;  %v119_v42 = vmul.f32 %v682_v33, %v841_v5  ;;  %v653_v46 = vunpack.c.l.bf16 %v693_v34  ;;  %v654_v47 = vunpack.c.h.bf16 %v693_v34 }
  0x27   :  { %vm1156_vm3 = vmneg %vm202_vm14  ;;  %v611_v40 = vpack.c.bf16 %v187_v31, %v186_v28  ;;  %v172_v44 = vmax.f32 %v140_v35, 0.0  ;;  %v156_v45 = vadd.f32 %v855_v11, %v118_v36  ;;  %v685_v51 = vunpack.c.l.bf16 %v701_v37 }
  0x28   :  { %vm570_vm9 = vmpackc.low %vm1145_vm6, %vm1156_vm3  ;;  %v157_v50 = vadd.f32 %v855_v11, %v119_v42  ;;  %v686_v52 = vunpack.c.h.bf16 %v701_v37  ;;  %vm221_vm13 = vcmp.ne.f32.partialorder %v682_v33, %v682_v33  ;;  %v104_v56 = vmul.f32 %v653_v46, %v841_v5 }
  0x29   :  { %vm1174_vm4 = vmneg %vm219_vm10  ;;  %v188_v54 = vmax.f32 %v156_v45, 0.0  ;;  %v105_v57 = vmul.f32 %v654_v47, %v841_v5  ;;  %vm220_vm14 = vcmp.ne.f32.partialorder %v681_v25, %v681_v25  ;;  %v120_v55 = vmul.f32 %v685_v51, %v841_v5 }
  0x2a   :  { %747 = vmatmul.mubr.msk.bf16.gmra.mrb[4].mxu0 %vm1362_vm1, %v561_v48  ;;  %763 = vmatmul.mubr.msk.bf16.gmra.mrb[4].mxu1 %vm600_vm0, %v601_v8  ;;  %vm205_vm0 = vcmp.ne.f32.partialorder %v650_v24, %v650_v24  ;;  %vm1180_vm8 = vmneg %vm218_vm5  ;;  %v173_v48 = vmax.f32 %v141_v41, 0.0  ;;  %v189_v49 = vmax.f32 %v157_v50, 0.0  ;;  %v142_v59 = vadd.f32 %v855_v11, %v104_v56 }
  0x2b   :  { %750 = vmatprep.mubr.msk.bf16.mxu0 %vm565_vm11, %v566_v9  ;;  %766 = vmatprep.mubr.msk.bf16.mxu1 %vm605_vm15, %v606_v15  ;;  %vm610_vm11 = vmpackc.low %vm1174_vm4, %vm1180_vm8  ;;  %v143_v60 = vadd.f32 %v855_v11, %v105_v57  ;;  %v121_v61 = vmul.f32 %v686_v52, %v841_v5  ;;  %vm207_vm6 = vcmp.ne.f32.partialorder %v654_v47, %v654_v47 }
  0x2c   :  { %vm1191_vm2 = vmneg %vm205_vm0  ;;  %v576_v58 = vpack.c.bf16 %v173_v48, %v172_v44  ;;  %v616_v62 = vpack.c.bf16 %v189_v49, %v188_v54  ;;  %v158_v63 = vadd.f32 %v855_v11, %v120_v55  ;;  %v174_v0 = vmax.f32 %v142_v59, 0.0 }
  0x2d   :  { %vm574_vm7 = vmneg %vm204_vm12  ;;  %v175_v1 = vmax.f32 %v143_v60, 0.0  ;;  %vm206_vm3 = vcmp.ne.f32.partialorder %v653_v46, %v653_v46  ;;  %v159_v2 = vadd.f32 %v855_v11, %v121_v61  ;;  %vm223_vm12 = vcmp.ne.f32.partialorder %v686_v52, %v686_v52 }
  0x2e   :  { %vm575_vm15 = vmpackc.low %vm1191_vm2, %vm574_vm7  ;;  %v190_v3 = vmax.f32 %v158_v63, 0.0  ;;  %vm222_vm4 = vcmp.ne.f32.partialorder %v685_v51, %v685_v51 }
  0x2f   :  { %vm613_vm1 = vmneg %vm221_vm13  ;;  %v581_v4 = vpack.c.bf16 %v175_v1, %v174_v0  ;;  %v191_v6 = vmax.f32 %v159_v2, 0.0 }
  0x30   :  { %vm614_vm10 = vmneg %vm220_vm14 }
  0x31   :  { %vm615_vm5 = vmpackc.low %vm613_vm1, %vm614_vm10  ;;  %v621_v5 = vpack.c.bf16 %v191_v6, %v190_v3 }
  0x32   :  { %751 = vmatmul.mubr.msk.bf16.gmra.mrb[8].mxu0 %vm570_vm9, %v571_v38  ;;  %767 = vmatmul.mubr.msk.bf16.gmra.mrb[8].mxu1 %vm610_vm11, %v611_v40  ;;  %vm578_vm9 = vmneg %vm207_vm6 }
  0x33   :  { %754 = vmatprep.mubr.msk.bf16.mxu0 %vm575_vm15, %v576_v58  ;;  %770 = vmatprep.mubr.msk.bf16.mxu1 %vm615_vm5, %v616_v62  ;;  %vm579_vm0 = vmneg %vm206_vm3 }
  0x34   :  { %vm580_vm8 = vmpackc.low %vm578_vm9, %vm579_vm0 }
  0x35   :  { %vm618_vm11 = vmneg %vm223_vm12 }
  0x36   :  { %vm619_vm2 = vmneg %vm222_vm4 }
  0x37   :  { %vm620_vm13 = vmpackc.low %vm618_vm11, %vm619_vm2 }
  0x3a   :  { %755 = vmatmul.mubr.msk.bf16.gmra.mrb[12].mxu0 %vm580_vm8, %v581_v4  ;;  %771 = vmatmul.mubr.msk.bf16.gmra.mrb[12].mxu1 %vm620_vm13, %v621_v5 }
  0xf5   :  { %v744_v7 = vpop.f32.mrb[0].mxu0  ;;  %v760_v8 = vpop.f32.mrb[0].mxu1 }
  0xf6   :  { %499 = vst [vmem:[%s1316_s4 + $0x10] sm:$0xff] %v744_v7  ;;  %515 = vst [vmem:[%s1316_s4 + $0x90] sm:$0xff] %v760_v8  ;;  %v370_v11 = vpop.f32.mrb[1].mxu0  ;;  %v434_v9 = vpop.f32.mrb[1].mxu1 }
  0xf7   :  { %497 = vst [vmem:[%s1316_s4] sm:$0xff] %v370_v11  ;;  %513 = vst [vmem:[%s1316_s4 + $0x80] sm:$0xff] %v434_v9  ;;  %v745_v10 = vpop.f32.mrb[2].mxu0  ;;  %v761_v12 = vpop.f32.mrb[2].mxu1 }
  0xf8   :  { %500 = vst [vmem:[%s1316_s4 + $0x18] sm:$0xff] %v745_v10  ;;  %516 = vst [vmem:[%s1316_s4 + $0x98] sm:$0xff] %v761_v12  ;;  %v373_v13 = vpop.f32.mrb[3].mxu0  ;;  %v437_v14 = vpop.f32.mrb[3].mxu1 }
  0xf9   :  { %498 = vst [vmem:[%s1316_s4 + $0x8] sm:$0xff] %v373_v13  ;;  %514 = vst [vmem:[%s1316_s4 + $0x88] sm:$0xff] %v437_v14 }
  0xfd   :  { %v748_v15 = vpop.f32.mrb[4].mxu0  ;;  %v764_v16 = vpop.f32.mrb[4].mxu1 }
  0xfe   :  { %503 = vst [vmem:[%s1316_s4 + $0x30] sm:$0xff] %v748_v15  ;;  %519 = vst [vmem:[%s1316_s4 + $0xb0] sm:$0xff] %v764_v16  ;;  %v386_v17 = vpop.f32.mrb[5].mxu0  ;;  %v450_v18 = vpop.f32.mrb[5].mxu1 }
  0xff   :  { %501 = vst [vmem:[%s1316_s4 + $0x20] sm:$0xff] %v386_v17  ;;  %517 = vst [vmem:[%s1316_s4 + $0xa0] sm:$0xff] %v450_v18  ;;  %v749_v19 = vpop.f32.mrb[6].mxu0  ;;  %v765_v20 = vpop.f32.mrb[6].mxu1 }
 0x100   :  { %504 = vst [vmem:[%s1316_s4 + $0x38] sm:$0xff] %v749_v19  ;;  %520 = vst [vmem:[%s1316_s4 + $0xb8] sm:$0xff] %v765_v20  ;;  %v389_v21 = vpop.f32.mrb[7].mxu0  ;;  %v453_v22 = vpop.f32.mrb[7].mxu1 }
 0x101   :  { %502 = vst [vmem:[%s1316_s4 + $0x28] sm:$0xff] %v389_v21  ;;  %518 = vst [vmem:[%s1316_s4 + $0xa8] sm:$0xff] %v453_v22 }
 0x105   :  { %v752_v23 = vpop.f32.mrb[8].mxu0  ;;  %v768_v24 = vpop.f32.mrb[8].mxu1 }
 0x106   :  { %507 = vst [vmem:[%s1316_s4 + $0x50] sm:$0xff] %v752_v23  ;;  %523 = vst [vmem:[%s1316_s4 + $0xd0] sm:$0xff] %v768_v24  ;;  %v402_v25 = vpop.f32.mrb[9].mxu0  ;;  %v466_v26 = vpop.f32.mrb[9].mxu1 }
 0x107   :  { %505 = vst [vmem:[%s1316_s4 + $0x40] sm:$0xff] %v402_v25  ;;  %521 = vst [vmem:[%s1316_s4 + $0xc0] sm:$0xff] %v466_v26  ;;  %v753_v27 = vpop.f32.mrb[10].mxu0  ;;  %v769_v28 = vpop.f32.mrb[10].mxu1 }
 0x108   :  { %508 = vst [vmem:[%s1316_s4 + $0x58] sm:$0xff] %v753_v27  ;;  %524 = vst [vmem:[%s1316_s4 + $0xd8] sm:$0xff] %v769_v28  ;;  %v405_v29 = vpop.f32.mrb[11].mxu0  ;;  %v469_v30 = vpop.f32.mrb[11].mxu1 }
 0x109   :  { %506 = vst [vmem:[%s1316_s4 + $0x48] sm:$0xff] %v405_v29  ;;  %522 = vst [vmem:[%s1316_s4 + $0xc8] sm:$0xff] %v469_v30 }
 0x10d   :  { %v756_v31 = vpop.f32.mrb[12].mxu0  ;;  %v772_v33 = vpop.f32.mrb[12].mxu1 }
 0x10e   :  { %511 = vst [vmem:[%s1316_s4 + $0x70] sm:$0xff] %v756_v31  ;;  %v418_v32 = vpop.f32.mrb[13].mxu0  ;;  %527 = vst [vmem:[%s1316_s4 + $0xf0] sm:$0xff] %v772_v33  ;;  %v482_v35 = vpop.f32.mrb[13].mxu1 }
 0x10f   :  { %509 = vst [vmem:[%s1316_s4 + $0x60] sm:$0xff] %v418_v32  ;;  %v757_v34 = vpop.f32.mrb[14].mxu0  ;;  %525 = vst [vmem:[%s1316_s4 + $0xe0] sm:$0xff] %v482_v35  ;;  %v773_v37 = vpop.f32.mrb[14].mxu1 }
 0x110   :  { %512 = vst [vmem:[%s1316_s4 + $0x78] sm:$0xff] %v757_v34  ;;  %v421_v36 = vpop.f32.mrb[15].mxu0  ;;  %528 = vst [vmem:[%s1316_s4 + $0xf8] sm:$0xff] %v773_v37  ;;  %v485_v38 = vpop.f32.mrb[15].mxu1 }
 0x111   :  { %510 = vst [vmem:[%s1316_s4 + $0x68] sm:$0xff] %v421_v36  ;;  %526 = vst [vmem:[%s1316_s4 + $0xe8] sm:$0xff] %v485_v38 }

</bundles_post_ra>
